<compile_context>
chip_gen: v6e
topology: v6e:2x2x1
jax: 0.10.0
libtpu: 0.0.40
codegen_flags: <defaults>
</compile_context>

<pallas_src>
import functools

import jax
import jax.numpy as jnp
from jax import lax
from jax.experimental import pallas as pl
from jax.experimental.pallas import tpu as pltpu


def _round_up(x, m):
    return (x + m - 1) // m * m


# ----------------------------------------------------------------------------
# Pallas GEMM kernels (bf16 MXU inputs, f32 accumulation, f32 epilogue, bf16 out)
# ----------------------------------------------------------------------------
def _gemm_kernel(a_ref, b_ref, bias_ref, o_ref, acc_ref, *, relu):
    k = pl.program_id(2)

    @pl.when(k == 0)
    def _():
        acc_ref[...] = jnp.zeros_like(acc_ref)

    acc_ref[...] += jnp.dot(a_ref[...], b_ref[...],
                            preferred_element_type=jnp.float32)

    @pl.when(k == pl.num_programs(2) - 1)
    def _():
        out = acc_ref[...] + bias_ref[...]
        if relu:
            out = jnp.maximum(out, 0.0)
        o_ref[...] = out.astype(o_ref.dtype)


def _gemm_res_kernel(a_ref, b_ref, bias_ref, res_ref, o_ref, acc_ref, *, relu):
    k = pl.program_id(2)

    @pl.when(k == 0)
    def _():
        acc_ref[...] = jnp.zeros_like(acc_ref)

    acc_ref[...] += jnp.dot(a_ref[...], b_ref[...],
                            preferred_element_type=jnp.float32)

    @pl.when(k == pl.num_programs(2) - 1)
    def _():
        # residual stored in bf16; upcast for the f32 epilogue arithmetic.
        out = acc_ref[...] + bias_ref[...] + res_ref[...].astype(jnp.float32)
        if relu:
            out = jnp.maximum(out, 0.0)
        o_ref[...] = out.astype(o_ref.dtype)


# ----------------------------------------------------------------------------
# Tile selection under an explicit VMEM budget (double buffers + f32 accumulator)
# ----------------------------------------------------------------------------
_VMEM_TILE_BUDGET = 24 * 1024 * 1024   # comfortably under v7x's 64 MiB / 32 MiB scoped


def _tile_vmem_bytes(tm, tk, tn, has_res):
    a = 2 * tm * tk * 2                # bf16 A, double-buffered
    b = 2 * tk * tn * 2                # bf16 B, double-buffered
    o = 2 * tm * tn * 2                # bf16 out, double-buffered
    r = 2 * tm * tn * 2 if has_res else 0
    bias = 2 * tn * 4
    acc = tm * tn * 4                  # f32 accumulator scratch
    return a + b + o + r + bias + acc


def _select_tiles(M, K, N, has_res):
    # ---- M tile: single full block for small M (pad tiny M to the bf16 sublane),
    #      otherwise the largest divisor of M in [128, 512] (no pad/slice HBM pass).
    if M <= 512:
        Mp = _round_up(M, 16)
        tm = Mp
    else:
        tm = None
        for cand in range(512, 127, -16):
            if M % cand == 0:
                tm = cand
                break
        if tm is None:                 # rare ragged M: pad (one extra small HBM pass)
            tm = 256
        Mp = _round_up(M, tm)

    # ---- N tile: lane-dense output slabs; keep >= 2 j-blocks when N allows so the
    #      v7x megacore always has a parallel axis even when i collapses to 1 block.
    if N % 128 != 0:
        tn = N
    else:
        tn = None
        for cand in (1024, 512, 256, 128):
            if N % cand == 0 and N // cand >= 2:
                tn = cand
                break
        if tn is None:                 # N == 128
            tn = N

    # ---- K tile: largest divisor of K (fewest accumulator round-trips on v5e/v6e)
    #      that fits the VMEM budget; span full K when K is not 128-aligned so the
    #      activation-side K is never padded/copied.
    if K % 128 != 0:
        tk = K
    else:
        tk = 128
        for cand in (2304, 2048, 1536, 1152, 1024, 768, 576, 512, 384, 256, 128):
            if K % cand == 0 and _tile_vmem_bytes(tm, cand, tn, has_res) <= _VMEM_TILE_BUDGET:
                tk = cand
                break
    return tm, tk, tn, Mp


def gemm_bias_act(a, b, bias, residual=None, relu=False, out_dtype=jnp.bfloat16):
    """a: (M, K) bf16 (or castable), b: (K, N) bf16, bias: (N,) f32,
    residual: (M, N) bf16 (optional).

    Computes relu_opt(a @ b + bias [+ residual]) with f32 accumulation; output is
    bf16 by default (halves HBM writeback and the next layer's read).
    """
    M, K = a.shape
    K2, N = b.shape
    assert K == K2
    has_res = residual is not None

    tm, tk, tn, Mp = _select_tiles(M, K, N, has_res)

    a_p = a if a.dtype == jnp.bfloat16 else a.astype(jnp.bfloat16)
    if Mp != M:
        a_p = jnp.pad(a_p, ((0, Mp - M), (0, 0)))
    bias_p = bias.reshape(1, N)

    grid = (Mp // tm, N // tn, K // tk)    # K innermost (accumulation axis)

    in_specs = [
        pl.BlockSpec((tm, tk), lambda i, j, k: (i, k)),
        pl.BlockSpec((tk, tn), lambda i, j, k: (k, j)),
        pl.BlockSpec((1, tn), lambda i, j, k: (0, j)),
    ]
    args = [a_p, b, bias_p]
    if has_res:
        assert residual.shape == (M, N)
        res_p = residual if residual.dtype == jnp.bfloat16 else residual.astype(jnp.bfloat16)
        if Mp != M:
            res_p = jnp.pad(res_p, ((0, Mp - M), (0, 0)))
        in_specs.append(pl.BlockSpec((tm, tn), lambda i, j, k: (i, j)))
        args.append(res_p)
        kernel = functools.partial(_gemm_res_kernel, relu=relu)
    else:
        kernel = functools.partial(_gemm_kernel, relu=relu)

    out = pl.pallas_call(
        kernel,
        out_shape=jax.ShapeDtypeStruct((Mp, N), out_dtype),
        grid=grid,
        in_specs=in_specs,
        out_specs=pl.BlockSpec((tm, tn), lambda i, j, k: (i, j)),
        scratch_shapes=[pltpu.VMEM((tm, tn), jnp.float32)],
        compiler_params=pltpu.CompilerParams(
            dimension_semantics=("parallel", "parallel", "arbitrary"),
            vmem_limit_bytes=40 * 1024 * 1024),
    )(*args)
    return out[:M] if Mp != M else out


# ----------------------------------------------------------------------------
# Conv (im2col glue in JAX on bf16, GEMM in Pallas) with prefolded BatchNorm weights
# ----------------------------------------------------------------------------
def conv2d_bn(x, cp, stride=1, padding=0, relu=False, residual=None):
    """x: NHWC bf16; cp: prepared conv dict (wmat bf16, bias f32, kh, kw, cin, cout)."""
    N, H, W, C = x.shape
    kh, kw, cin, cout = cp["kh"], cp["kw"], cp["cin"], cp["cout"]
    assert cin == C
    Ho = (H + 2 * padding - kh) // stride + 1
    Wo = (W + 2 * padding - kw) // stride + 1
    if padding:
        xp = jnp.pad(x, ((0, 0), (padding, padding), (padding, padding), (0, 0)))
    else:
        xp = x

    if kh == 1 and kw == 1 and stride == 1:
        # 1x1 stride-1 conv: pure GEMM, no im2col expansion at all.
        a = xp.reshape(N * H * W, C)
    elif kh == 1 and kw == 1:
        # 1x1 strided conv (downsample projection): single strided slice, no concat.
        a = lax.slice(xp, (0, 0, 0, 0),
                      (N, stride * (Ho - 1) + 1, stride * (Wo - 1) + 1, C),
                      (1, stride, stride, 1)).reshape(N * Ho * Wo, C)
    else:
        # im2col over bf16 activations (half the intermediate HBM traffic vs f32).
        patches = []
        for i in range(kh):
            for j in range(kw):
                patches.append(
                    lax.slice(xp,
                              (0, i, j, 0),
                              (N, i + stride * (Ho - 1) + 1,
                               j + stride * (Wo - 1) + 1, C),
                              (1, stride, stride, 1)))
        a = jnp.concatenate(patches, axis=-1).reshape(N * Ho * Wo, kh * kw * C)

    coutp = cp["wmat"].shape[1]
    res = None
    if residual is not None:
        res = residual.reshape(N * Ho * Wo, residual.shape[-1])
        if res.shape[1] != coutp:
            res = jnp.pad(res, ((0, 0), (0, coutp - res.shape[1])))

    out = gemm_bias_act(a, cp["wmat"], cp["bias"], residual=res, relu=relu)
    if coutp != cout:
        out = out[:, :cout]                 # drop lane-padding channels
    return out.reshape(N, Ho, Wo, cout)


# ----------------------------------------------------------------------------
# MaxPool 3x3 / stride 2 / pad 1 — fused tree of maxima over the 9 taps (XLA, bf16).
# TODO(synk): could be fused into a small Pallas kernel with conv1's epilogue.
# ----------------------------------------------------------------------------
def maxpool_3x3_s2(x):
    N, H, W, C = x.shape
    Ho = (H + 2 - 3) // 2 + 1
    Wo = (W + 2 - 3) // 2 + 1
    neg = float(jnp.finfo(x.dtype).min)
    xp = jnp.pad(x, ((0, 0), (1, 1), (1, 1), (0, 0)), constant_values=neg)
    out = None
    for i in range(3):
        for j in range(3):
            s = lax.slice(xp,
                          (0, i, j, 0),
                          (N, i + 2 * (Ho - 1) + 1, j + 2 * (Wo - 1) + 1, C),
                          (1, 2, 2, 1))
            out = s if out is None else jnp.maximum(out, s)
    return out


# ----------------------------------------------------------------------------
# Parameter construction (deterministic synthetic init, ResNet-50 shapes)
# ----------------------------------------------------------------------------
def _conv_bn_params(key, cin, cout, kh, kw):
    k1, k2, k3, k4, k5 = jax.random.split(key, 5)
    fan_in = cin * kh * kw
    w = jax.random.normal(k1, (cout, cin, kh, kw), jnp.float32) * jnp.sqrt(2.0 / fan_in)
    gamma = 1.0 + 0.1 * jax.random.normal(k2, (cout,), jnp.float32)
    beta = 0.1 * jax.random.normal(k3, (cout,), jnp.float32)
    running_mean = 0.1 * jax.random.normal(k4, (cout,), jnp.float32)
    running_var = 1.0 + 0.1 * jax.random.uniform(k5, (cout,), jnp.float32)
    eps = 1e-5
    scale = gamma / jnp.sqrt(running_var + eps)
    bias = beta - running_mean * scale
    return {"w": w, "scale": scale, "bias": bias}


def _bottleneck_params(key, cin, width, stride, downsample):
    keys = jax.random.split(key, 4)
    p = {
        "conv1": _conv_bn_params(keys[0], cin, width, 1, 1),
        "conv2": _conv_bn_params(keys[1], width, width, 3, 3),
        "conv3": _conv_bn_params(keys[2], width, width * 4, 1, 1),
        "stride": stride,
    }
    if downsample:
        p["downsample"] = _conv_bn_params(keys[3], cin, width * 4, 1, 1)
    return p


def make_resnet50_params(key, num_classes=3):
    params = {}
    key, k = jax.random.split(key)
    params["conv1"] = _conv_bn_params(k, 3, 64, 7, 7)
    cfg = [("layer1", 64, 3, 1), ("layer2", 128, 4, 2),
           ("layer3", 256, 6, 2), ("layer4", 512, 3, 2)]
    cin = 64
    for name, width, nblocks, stride in cfg:
        blocks = []
        for b in range(nblocks):
            key, k = jax.random.split(key)
            s = stride if b == 0 else 1
            ds = (b == 0)  # first block of each layer has a projection shortcut
            blocks.append(_bottleneck_params(k, cin, width, s, ds))
            cin = width * 4
        params[name] = blocks
    key, k1, k2 = jax.random.split(key, 3)
    bound = 1.0 / jnp.sqrt(2048.0)
    params["fc"] = {
        "w": jax.random.uniform(k1, (2048, num_classes), jnp.float32, -bound, bound),
        "b": jax.random.uniform(k2, (num_classes,), jnp.float32, -bound, bound),
    }
    return params


# ----------------------------------------------------------------------------
# One-time parameter preparation: fold BN into the conv weights, reshape to
# (kh*kw*Cin, Cout), pad conv1 Cin 3->8 (sublane-friendly K), lane-pad Cout < 128,
# cast weights to bf16.
# ----------------------------------------------------------------------------
def _prepare_conv(raw, pad_cin_to=None):
    w = raw["w"]                      # (Cout, Cin, kh, kw), PyTorch layout
    cout, cin, kh, kw = w.shape
    scale, bias = raw["scale"], raw["bias"]
    if pad_cin_to is not None and pad_cin_to != cin:
        w = jnp.pad(w, ((0, 0), (0, pad_cin_to - cin), (0, 0), (0, 0)))
        cin = pad_cin_to
    wmat = jnp.transpose(w, (2, 3, 1, 0)).reshape(kh * kw * cin, cout)
    wmat = wmat * scale[None, :]      # fold BN scale into conv weights
    coutp = max(_round_up(cout, 128), 128)
    if coutp != cout:
        wmat = jnp.pad(wmat, ((0, 0), (0, coutp - cout)))
        bias = jnp.pad(bias, (0, coutp - cout))
    return {"wmat": wmat.astype(jnp.bfloat16),
            "bias": bias.astype(jnp.float32),
            "kh": kh, "kw": kw, "cin": cin, "cout": cout}


def prepare_resnet50_params(params):
    prep = {"conv1": _prepare_conv(params["conv1"], pad_cin_to=8)}
    for name in ("layer1", "layer2", "layer3", "layer4"):
        blocks = []
        for blk in params[name]:
            pb = {"conv1": _prepare_conv(blk["conv1"]),
                  "conv2": _prepare_conv(blk["conv2"]),
                  "conv3": _prepare_conv(blk["conv3"]),
                  "stride": blk["stride"]}
            if "downsample" in blk:
                pb["downsample"] = _prepare_conv(blk["downsample"])
            blocks.append(pb)
        prep[name] = blocks
    w, b = params["fc"]["w"], params["fc"]["b"]
    nc = w.shape[1]
    ncp = max(_round_up(nc, 128), 128)
    if ncp != nc:
        w = jnp.pad(w, ((0, 0), (0, ncp - nc)))
        b = jnp.pad(b, (0, ncp - nc))
    prep["fc"] = {"wmat": w.astype(jnp.bfloat16),
                  "bias": b.astype(jnp.float32), "nc": nc}
    return prep


# ----------------------------------------------------------------------------
# Forward pass (bf16 activations end-to-end; f32 accumulation / epilogue / logits)
# ----------------------------------------------------------------------------
def bottleneck_forward(x, p):
    stride = p["stride"]
    out = conv2d_bn(x, p["conv1"], stride=1, padding=0, relu=True)
    out = conv2d_bn(out, p["conv2"], stride=stride, padding=1, relu=True)
    if "downsample" in p:
        identity = conv2d_bn(x, p["downsample"], stride=stride, padding=0, relu=False)
    else:
        identity = x
    # conv3 + bn3, then residual add, then ReLU — all fused in the GEMM epilogue.
    out = conv2d_bn(out, p["conv3"], stride=1, padding=0, relu=True, residual=identity)
    return out


def resnet50_forward(x_nchw, prep):
    # layout: input is NCHW (PyTorch convention); kernels operate in NHWC (bf16).
    x = jnp.transpose(x_nchw, (0, 2, 3, 1)).astype(jnp.bfloat16)
    cin_pad = prep["conv1"]["cin"]
    if x.shape[-1] != cin_pad:        # pad RGB 3 -> 8 once; conv1 weights have zero rows
        x = jnp.pad(x, ((0, 0), (0, 0), (0, 0), (0, cin_pad - x.shape[-1])))
    x = conv2d_bn(x, prep["conv1"], stride=2, padding=3, relu=True)
    x = maxpool_3x3_s2(x)
    for layer in ("layer1", "layer2", "layer3", "layer4"):
        for blk in prep[layer]:
            x = bottleneck_forward(x, blk)
    # Global average pool: tiny f32 reduction (XLA), feeds the fc GEMM directly.
    pooled = jnp.mean(x.astype(jnp.float32), axis=(1, 2))        # (N, 2048)
    fc = prep["fc"]
    logits = gemm_bias_act(pooled, fc["wmat"], fc["bias"],
                           out_dtype=jnp.float32)[:, :fc["nc"]]
    return logits


if __name__ == "__main__":
    key = jax.random.PRNGKey(0)
    pkey, xkey = jax.random.split(key)
    raw_params = make_resnet50_params(pkey, num_classes=3)
    params = prepare_resnet50_params(raw_params)   # one-time BN fold / pack / bf16 cast
    # NCHW input, spatial 32 so the /32 downsampling of ResNet-50 works out.
    x = jax.random.normal(xkey, (2, 3, 32, 32), jnp.float32)
    logits = resnet50_forward(x, params)
    jax.block_until_ready(logits)
    assert logits.shape == (2, 3)
    assert bool(jnp.all(jnp.isfinite(logits)))
    print("KERNEL_OK")
</pallas_src>

<mosaic_0001>
module attributes {stable_mosaic.version = 11 : i64} {
  func.func @_gemm_kernel(%arg0: i32, %arg1: i32, %arg2: i32, %arg3: memref<512x392xbf16, #tpu.memory_space<vmem>>, %arg4: memref<392x128xbf16, #tpu.memory_space<vmem>>, %arg5: memref<1x128xf32, #tpu.memory_space<vmem>>, %arg6: memref<512x128xbf16, #tpu.memory_space<vmem>>, %arg7: memref<512x128xf32, #tpu.memory_space<vmem>>) attributes {dimension_semantics = [#tpu.dimension_semantics<parallel>, #tpu.dimension_semantics<parallel>, #tpu.dimension_semantics<arbitrary>], iteration_bounds = array<i64: 1, 1, 1>, scalar_prefetch = 0 : i64, scratch_operands = 1 : i64, tpu.core_type = #tpu.core_type<tc>, window_params = [{transform_indices = @transform_0, window_bounds = array<i64: 512, 392>}, {transform_indices = @transform_1, window_bounds = array<i64: 392, 128>}, {transform_indices = @transform_2, window_bounds = array<i64: 1, 128>}, {transform_indices = @transform_3, window_bounds = array<i64: 512, 128>}]} {
    %c0_i32 = arith.constant 0 : i32
    %0 = arith.cmpi eq, %arg2, %c0_i32 : i32
    %1 = arith.extui %0 : i1 to i32
    %c0_i32_0 = arith.constant 0 : i32
    %2 = arith.cmpi ne, %1, %c0_i32_0 : i32
    scf.if %2 {
      %cst_10 = arith.constant 0.000000e+00 : f32
      %12 = vector.broadcast %cst_10 : f32 to vector<512x128xf32>
      %c0_11 = arith.constant 0 : index
      %c0_12 = arith.constant 0 : index
      %13 = vector.load %arg7[%c0_11, %c0_12] : memref<512x128xf32, #tpu.memory_space<vmem>>, vector<512x128xf32>
      tpu.vector_store %arg7[%c0_11, %c0_12], %12 {strides = array<i32>} : memref<512x128xf32, #tpu.memory_space<vmem>>, vector<512x128xf32>,
    } else {
    }
    %c0 = arith.constant 0 : index
    %c0_1 = arith.constant 0 : index
    %3 = vector.load %arg7[%c0, %c0_1] : memref<512x128xf32, #tpu.memory_space<vmem>>, vector<512x128xf32>
    %c0_2 = arith.constant 0 : index
    %c0_3 = arith.constant 0 : index
    %4 = vector.load %arg3[%c0_2, %c0_3] : memref<512x392xbf16, #tpu.memory_space<vmem>>, vector<512x392xbf16>
    %c0_4 = arith.constant 0 : index
    %c0_5 = arith.constant 0 : index
    %5 = vector.load %arg4[%c0_4, %c0_5] : memref<392x128xbf16, #tpu.memory_space<vmem>>, vector<392x128xbf16>
    %cst = arith.constant dense<0.000000e+00> : vector<512x128xf32>
    %6 = tpu.matmul %4, %5, %cst {dimension_numbers = #tpu.dot_dimension_numbers<[1], [0], [0], [1], [0, 0, 1, 1], [], []>} : vector<512x392xbf16>, vector<392x128xbf16>, vector<512x128xf32> -> vector<512x128xf32>
    %7 = arith.addf %3, %6 : vector<512x128xf32>
    %c0_6 = arith.constant 0 : index
    %c0_7 = arith.constant 0 : index
    %8 = vector.load %arg7[%c0_6, %c0_7] : memref<512x128xf32, #tpu.memory_space<vmem>>, vector<512x128xf32>
    tpu.vector_store %arg7[%c0_6, %c0_7], %7 {strides = array<i32>} : memref<512x128xf32, #tpu.memory_space<vmem>>, vector<512x128xf32>,
    %c0_i32_8 = arith.constant 0 : i32
    %9 = arith.cmpi eq, %arg2, %c0_i32_8 : i32
    %10 = arith.extui %9 : i1 to i32
    %c0_i32_9 = arith.constant 0 : i32
    %11 = arith.cmpi ne, %10, %c0_i32_9 : i32
    scf.if %11 {
      %c0_10 = arith.constant 0 : index
      %c0_11 = arith.constant 0 : index
      %12 = vector.load %arg7[%c0_10, %c0_11] : memref<512x128xf32, #tpu.memory_space<vmem>>, vector<512x128xf32>
      %c0_12 = arith.constant 0 : index
      %c0_13 = arith.constant 0 : index
      %13 = vector.load %arg5[%c0_12, %c0_13] : memref<1x128xf32, #tpu.memory_space<vmem>>, vector<1x128xf32>
      %14 = vector.broadcast %13 : vector<1x128xf32> to vector<512x128xf32>
      %15 = arith.addf %12, %14 : vector<512x128xf32>
      %cst_14 = arith.constant 0.000000e+00 : f32
      %16 = vector.broadcast %cst_14 : f32 to vector<512x128xf32>
      %17 = arith.maximumf %15, %16 : vector<512x128xf32>
      %18 = arith.truncf %17 : vector<512x128xf32> to vector<512x128xbf16>
      %c0_15 = arith.constant 0 : index
      %c0_16 = arith.constant 0 : index
      %19 = vector.load %arg6[%c0_15, %c0_16] : memref<512x128xbf16, #tpu.memory_space<vmem>>, vector<512x128xbf16>
      tpu.vector_store %arg6[%c0_15, %c0_16], %18 {strides = array<i32>} : memref<512x128xbf16, #tpu.memory_space<vmem>>, vector<512x128xbf16>,
    } else {
    }
    return
  }
  func.func @transform_0(%arg0: i32, %arg1: i32, %arg2: i32) -> (i32, i32) {
    %c0_i32 = arith.constant 0 : i32
    return %arg0, %arg2 : i32, i32
  }
  func.func @transform_1(%arg0: i32, %arg1: i32, %arg2: i32) -> (i32, i32) {
    %c0_i32 = arith.constant 0 : i32
    return %arg2, %arg1 : i32, i32
  }
  func.func @transform_2(%arg0: i32, %arg1: i32, %arg2: i32) -> (i32, i32) {
    %c0_i32 = arith.constant 0 : i32
    %c0_i32_0 = arith.constant 0 : i32
    return %c0_i32, %arg1 : i32, i32
  }
  func.func @transform_3(%arg0: i32, %arg1: i32, %arg2: i32) -> (i32, i32) {
    %c0_i32 = arith.constant 0 : i32
    return %arg0, %arg1 : i32, i32
  }
}

</mosaic_0001>

<bundles_post_ra>
// kernel: tpu_custom_call.1
= control target key start
LH: loop header
LB: loop body
LE: loop exit
PB: predicated region body
PF: predicated region fallthrough
CT: control target
= control target key end

     0   :  { %v3174_v1 = vmov 0   ;;  %vm1080_vm0 = vcmask 64512   ;;  %vm1177_vm1 = vcmask 1043456   ;;  %s3805_s0 = inlined_call_operand.vmem [shape: bf16[512,392], index: 0, kind: input, shape index: {}]   ;;  %s3806_s1 = inlined_call_operand.vmem [shape: bf16[392,128], index: 1, kind: input, shape index: {}]   ;;  %s3807_s2 = inlined_call_operand.vmem [shape: f32[1,128], index: 2, kind: input, shape index: {}]   ;;  %s3808_s3 = inlined_call_operand.hbm [shape: bf16[512,128], index: 3, kind: output, shape index: {}]  }
   0x1   :  { %v2934_v0 = vld [vmem:[%s3806_s1 + $0x38] sm:$0xff]   ;;  %1181 = vmatprep.subr.bf16.mxu0 %v3174_v1  ;;  %1470 = vmatprep.subr.bf16.mxu1 %v3174_v1  ;;  %v2935_v2 = vld [vmem:[%s3806_s1 + $0x30] sm:$0xff]   ;;  %v2936_v3 = vld [vmem:[%s3806_s1 + $0x28] sm:$0xff]  }
   0x2   :  { %1182 = vmatpush1.bf16.msra.mxu0 %v2934_v0  ;;  %v2940_v4 = vld [vmem:[%s3806_s1 + $0xb8] sm:$0xff]   ;;  %v2942_v5 = vld [vmem:[%s3806_s1 + $0xb0] sm:$0xff]   ;;  %v2937_v6 = vld [vmem:[%s3806_s1 + $0x20] sm:$0xff]  }
   0x3   :  { %1183 = vmatprep.subr.bf16.mxu0 %v3174_v1  ;;  %1471 = vmatpush1.bf16.msra.mxu1 %v2940_v4  ;;  %v2944_v7 = vld [vmem:[%s3806_s1 + $0xa8] sm:$0xff]   ;;  %v2938_v8 = vld [vmem:[%s3806_s1 + $0x18] sm:$0xff]   ;;  %v2946_v9 = vld [vmem:[%s3806_s1 + $0xa0] sm:$0xff]  }
   0x4   :  { %1472 = vmatprep.subr.bf16.mxu1 %v3174_v1  ;;  %v2939_v10 = vld [vmem:[%s3806_s1 + $0x10] sm:$0xff]   ;;  %v2948_v11 = vld [vmem:[%s3806_s1 + $0x98] sm:$0xff]   ;;  %v2941_v12 = vld [vmem:[%s3806_s1 + $0x8] sm:$0xff]  }
   0x5   :  { %v2950_v13 = vld [vmem:[%s3806_s1 + $0x90] sm:$0xff]   ;;  %v2960_v14 = vld [vmem:[%s3805_s0 + $0xc] ss:$16 sps:$4 sm:$0xff]   ;;  %v2943_v15 = vld [vmem:[%s3806_s1] sm:$0xff]  }
   0x6   :  { %1184 = vmatpush1.bf16.msra.mxu0 %v2935_v2  ;;  %2578 = vmatprep.mubr.msk.bf16.mxu1 %vm1080_vm0, %v2960_v14  ;;  %v2964_v16 = vld [vmem:[%s3805_s0 + $0x4] ss:$16 sps:$4 sm:$0xff]   ;;  %v2952_v17 = vld [vmem:[%s3806_s1 + $0x88] sm:$0xff]   ;;  %v2945_v18 = vld [vmem:[%s3806_s1 + $0x78] sm:$0xff]  }
   0x7   :  { %1185 = vmatprep.subr.bf16.mxu0 %v3174_v1  ;;  %1473 = vmatpush1.bf16.msra.mxu1 %v2942_v5  ;;  %v2954_v19 = vld [vmem:[%s3806_s1 + $0x80] sm:$0xff]   ;;  %v2947_v21 = vld [vmem:[%s3806_s1 + $0x70] sm:$0xff]   ;;  %v2949_v23 = vld [vmem:[%s3806_s1 + $0x68] sm:$0xff]  }
   0x8   :  { %1474 = vmatprep.subr.bf16.mxu1 %v3174_v1  ;;  %1213 = vmatprep.mubr.bf16.mxu0 %v2964_v16  ;;  %v2956_v20 = vld [vmem:[%s3806_s1 + $0xc0] ss:$0 sps:$4 sm:$0xff]   ;;  %v2958_v24 = vld [vmem:[%s3805_s0 + $0x8] ss:$16 sps:$4 sm:$0xff]   ;;  %v2965_v25 = vld [vmem:[%s3805_s0 + $0x2c] ss:$16 sps:$4 sm:$0xff]  }
   0x9   :  { %v1179_v22 = vsel %vm1177_vm1, %v2956_v20, 0  ;;  %v2951_v26 = vld [vmem:[%s3806_s1 + $0x60] sm:$0xff]   ;;  %v2953_v27 = vld [vmem:[%s3806_s1 + $0x58] sm:$0xff]   ;;  %v2955_v30 = vld [vmem:[%s3806_s1 + $0x50] sm:$0xff]  }
   0xa   :  { %1186 = vmatpush1.bf16.msra.mxu0 %v2936_v3  ;;  %v2967_v28 = vld [vmem:[%s3805_s0 + $0x28] ss:$16 sps:$4 sm:$0xff]   ;;  %v2971_v29 = vld [vmem:[%s3805_s0 + $0x4c] ss:$16 sps:$4 sm:$0xff]   ;;  %v2961_v34 = vld [vmem:[%s3806_s1 + $0x40] sm:$0xff]  }
   0xb   :  { %1187 = vmatprep.subr.bf16.mxu0 %v3174_v1  ;;  %1475 = vmatpush1.bf16.msra.mxu1 %v2944_v7  ;;  %v2957_v31 = vld [vmem:[%s3806_s1 + $0x48] sm:$0xff]   ;;  %v2962_v35 = vld [vmem:[%s3805_s0] ss:$16 sps:$4 sm:$0xff]   ;;  %v2968_v36 = vld [vmem:[%s3805_s0 + $0x24] ss:$16 sps:$4 sm:$0xff]  }
   0xc   :  { %1476 = vmatprep.subr.bf16.mxu1 %v3174_v1  ;;  %v2973_v32 = vld [vmem:[%s3805_s0 + $0x48] ss:$16 sps:$4 sm:$0xff]   ;;  %v2977_v33 = vld [vmem:[%s3805_s0 + $0x6c] ss:$16 sps:$4 sm:$0xff]   ;;  %v2970_v39 = vld [vmem:[%s3805_s0 + $0x20] ss:$16 sps:$4 sm:$0xff]  }
   0xd   :  { %v2979_v37 = vld [vmem:[%s3805_s0 + $0x68] ss:$16 sps:$4 sm:$0xff]   ;;  %v2983_v38 = vld [vmem:[%s3805_s0 + $0x8c] ss:$16 sps:$4 sm:$0xff]   ;;  %v2974_v40 = vld [vmem:[%s3805_s0 + $0x44] ss:$16 sps:$4 sm:$0xff]  }
   0xe   :  { %1188 = vmatpush1.bf16.msra.mxu0 %v2937_v6  ;;  %v2985_v41 = vld [vmem:[%s3805_s0 + $0x88] ss:$16 sps:$4 sm:$0xff]   ;;  %v2989_v42 = vld [vmem:[%s3805_s0 + $0xac] ss:$16 sps:$4 sm:$0xff]   ;;  %v2976_v43 = vld [vmem:[%s3805_s0 + $0x40] ss:$16 sps:$4 sm:$0xff]  }
   0xf   :  { %1189 = vmatprep.subr.bf16.mxu0 %v3174_v1  ;;  %1477 = vmatpush1.bf16.msra.mxu1 %v2946_v9  ;;  %v2980_v44 = vld [vmem:[%s3805_s0 + $0x64] ss:$16 sps:$4 sm:$0xff]   ;;  %v2991_v45 = vld [vmem:[%s3805_s0 + $0xa8] ss:$16 sps:$4 sm:$0xff]   ;;  %v2995_v46 = vld [vmem:[%s3805_s0 + $0xcc] ss:$16 sps:$4 sm:$0xff]  }
  0x10   :  { %1478 = vmatprep.subr.bf16.mxu1 %v3174_v1  ;;  %v2982_v47 = vld [vmem:[%s3805_s0 + $0x60] ss:$16 sps:$4 sm:$0xff]   ;;  %v2986_v48 = vld [vmem:[%s3805_s0 + $0x84] ss:$16 sps:$4 sm:$0xff]   ;;  %v2997_v49 = vld [vmem:[%s3805_s0 + $0xc8] ss:$16 sps:$4 sm:$0xff]  }
  0x11   :  { %v3001_v50 = vld [vmem:[%s3805_s0 + $0xec] ss:$16 sps:$4 sm:$0xff]   ;;  %v2988_v51 = vld [vmem:[%s3805_s0 + $0x80] ss:$16 sps:$4 sm:$0xff]   ;;  %v2992_v52 = vld [vmem:[%s3805_s0 + $0xa4] ss:$16 sps:$4 sm:$0xff]  }
  0x12   :  { %1190 = vmatpush1.bf16.msra.mxu0 %v2938_v8  ;;  %v3003_v53 = vld [vmem:[%s3805_s0 + $0xe8] ss:$16 sps:$4 sm:$0xff]  }
  0x13   :  { %1191 = vmatprep.subr.bf16.mxu0 %v3174_v1  ;;  %1479 = vmatpush1.bf16.msra.mxu1 %v2948_v11 }
  0x14   :  { %1480 = vmatprep.subr.bf16.mxu1 %v3174_v1 }
  0x16   :  { %1192 = vmatpush1.bf16.msra.mxu0 %v2939_v10 }
  0x17   :  { %1193 = vmatprep.subr.bf16.mxu0 %v3174_v1  ;;  %1481 = vmatpush1.bf16.msra.mxu1 %v2950_v13 }
  0x18   :  { %1482 = vmatprep.subr.bf16.mxu1 %v3174_v1 }
  0x1a   :  { %1194 = vmatpush1.bf16.msra.mxu0 %v2941_v12 }
  0x1b   :  { %1195 = vmatprep.subr.bf16.mxu0 %v3174_v1  ;;  %1483 = vmatpush1.bf16.msra.mxu1 %v2952_v17 }
  0x1c   :  { %1484 = vmatprep.subr.bf16.mxu1 %v3174_v1 }
  0x1e   :  { %1196 = vmatpush1.bf16.msra.mxu0 %v2943_v15 }
  0x1f   :  { %1197 = vmatprep.subr.bf16.mxu0 %v3174_v1  ;;  %1485 = vmatpush1.bf16.msra.mxu1 %v2954_v19 }
  0x20   :  { %1500 = vmatprep.subr.bf16.mxu1 %v3174_v1 }
  0x22   :  { %1198 = vmatpush2.bf16.msra.mxu0 %v2945_v18 }
  0x23   :  { %1199 = vmatprep.subr.bf16.mxu0 %v3174_v1  ;;  %1501 = vmatpush2.bf16.msra.mxu1 %v1179_v22 }
  0x26   :  { %1200 = vmatpush2.bf16.msra.mxu0 %v2947_v21  ;;  %1503 = vmatmul.mubr.bf16.vlgmr.msra.gmra.mxu1 %v2958_v24 }
  0x27   :  { %1201 = vmatprep.subr.bf16.mxu0 %v3174_v1  ;;  %2579 = vmatprep.mubr.msk.bf16.mxu1 %vm1080_vm0, %v2965_v25 }
  0x2a   :  { %1202 = vmatpush2.bf16.msra.mxu0 %v2949_v23 }
  0x2b   :  { %1203 = vmatprep.subr.bf16.mxu0 %v3174_v1 }
  0x2e   :  { %1204 = vmatpush2.bf16.msra.mxu0 %v2951_v26  ;;  %1511 = vmatmul.mubr.bf16.gmra.mxu1 %v2967_v28 }
  0x2f   :  { %1205 = vmatprep.subr.bf16.mxu0 %v3174_v1  ;;  %2580 = vmatprep.mubr.msk.bf16.mxu1 %vm1080_vm0, %v2971_v29 }
  0x32   :  { %1206 = vmatpush2.bf16.msra.mxu0 %v2953_v27 }
  0x33   :  { %1207 = vmatprep.subr.bf16.mxu0 %v3174_v1 }
  0x36   :  { %1208 = vmatpush2.bf16.msra.mxu0 %v2955_v30  ;;  %1519 = vmatmul.mubr.bf16.gmra.mxu1 %v2973_v32 }
  0x37   :  { %1209 = vmatprep.subr.bf16.mxu0 %v3174_v1  ;;  %2581 = vmatprep.mubr.msk.bf16.mxu1 %vm1080_vm0, %v2977_v33 }
  0x3a   :  { %1210 = vmatpush2.bf16.msra.mxu0 %v2957_v31 }
  0x3b   :  { %1211 = vmatprep.subr.bf16.mxu0 %v3174_v1 }
  0x3e   :  { %1212 = vmatpush2.bf16.msra.mxu0 %v2961_v34  ;;  %1527 = vmatmul.mubr.bf16.gmra.mxu1 %v2979_v37 }
  0x3f   :  { %2582 = vmatprep.mubr.msk.bf16.mxu1 %vm1080_vm0, %v2983_v38 }
  0x41   :  { %1214 = vmatmul.mubr.bf16.vlgmr.msra.gmra.mxu0 %v2962_v35 }
  0x42   :  { %1221 = vmatprep.mubr.bf16.mxu0 %v2968_v36 }
  0x46   :  { %1535 = vmatmul.mubr.bf16.gmra.mxu1 %v2985_v41 }
  0x47   :  { %2583 = vmatprep.mubr.msk.bf16.mxu1 %vm1080_vm0, %v2989_v42 }
  0x49   :  { %1222 = vmatmul.mubr.bf16.gmra.mxu0 %v2970_v39 }
  0x4a   :  { %1229 = vmatprep.mubr.bf16.mxu0 %v2974_v40 }
  0x4e   :  { %1543 = vmatmul.mubr.bf16.gmra.mxu1 %v2991_v45 }
  0x4f   :  { %2584 = vmatprep.mubr.msk.bf16.mxu1 %vm1080_vm0, %v2995_v46 }
  0x51   :  { %1230 = vmatmul.mubr.bf16.gmra.mxu0 %v2976_v43 }
  0x52   :  { %1237 = vmatprep.mubr.bf16.mxu0 %v2980_v44 }
  0x56   :  { %1551 = vmatmul.mubr.bf16.gmra.mxu1 %v2997_v49 }
  0x57   :  { %2585 = vmatprep.mubr.msk.bf16.mxu1 %vm1080_vm0, %v3001_v50 }
  0x59   :  { %1238 = vmatmul.mubr.bf16.gmra.mxu0 %v2982_v47 }
  0x5a   :  { %1245 = vmatprep.mubr.bf16.mxu0 %v2986_v48 }
  0x5b   :  { %8 = vsyncpa [#allocation4], 0  ;;  %v3007_v54 = vld [vmem:[%s3805_s0 + $0x10c] ss:$16 sps:$4 sm:$0xff]   ;;  %v2994_v55 = vld [vmem:[%s3805_s0 + $0xa0] ss:$16 sps:$4 sm:$0xff]  }
  0x5c   :  { %v2998_v56 = vld [vmem:[%s3805_s0 + $0xc4] ss:$16 sps:$4 sm:$0xff]   ;;  %v3009_v57 = vld [vmem:[%s3805_s0 + $0x108] ss:$16 sps:$4 sm:$0xff]   ;;  %v3013_v58 = vld [vmem:[%s3805_s0 + $0x12c] ss:$16 sps:$4 sm:$0xff]  }
  0x5d   :  { %v3000_v59 = vld [vmem:[%s3805_s0 + $0xc0] ss:$16 sps:$4 sm:$0xff]   ;;  %v3004_v60 = vld [vmem:[%s3805_s0 + $0xe4] ss:$16 sps:$4 sm:$0xff]   ;;  %v3015_v61 = vld [vmem:[%s3805_s0 + $0x128] ss:$16 sps:$4 sm:$0xff]  }
  0x5e   :  { %1559 = vmatmul.mubr.bf16.gmra.mxu1 %v3003_v53  ;;  %v3019_v62 = vld [vmem:[%s3805_s0 + $0x14c] ss:$16 sps:$4 sm:$0xff]   ;;  %v3006_v63 = vld [vmem:[%s3805_s0 + $0xe0] ss:$16 sps:$4 sm:$0xff]   ;;  %v3010_v0 = vld [vmem:[%s3805_s0 + $0x104] ss:$16 sps:$4 sm:$0xff]  }
  0x5f   :  { %2586 = vmatprep.mubr.msk.bf16.mxu1 %vm1080_vm0, %v3007_v54  ;;  %v3021_v1 = vld [vmem:[%s3805_s0 + $0x148] ss:$16 sps:$4 sm:$0xff]   ;;  %v3025_v2 = vld [vmem:[%s3805_s0 + $0x16c] ss:$16 sps:$4 sm:$0xff]   ;;  %v3012_v3 = vld [vmem:[%s3805_s0 + $0x100] ss:$16 sps:$4 sm:$0xff]  }
  0x60   :  { %v3016_v4 = vld [vmem:[%s3805_s0 + $0x124] ss:$16 sps:$4 sm:$0xff]   ;;  %v3027_v5 = vld [vmem:[%s3805_s0 + $0x168] ss:$16 sps:$4 sm:$0xff]   ;;  %v3031_v6 = vld [vmem:[%s3805_s0 + $0x18c] ss:$16 sps:$4 sm:$0xff]  }
  0x61   :  { %1246 = vmatmul.mubr.bf16.gmra.mxu0 %v2988_v51  ;;  %v3018_v7 = vld [vmem:[%s3805_s0 + $0x120] ss:$16 sps:$4 sm:$0xff]   ;;  %v3022_v8 = vld [vmem:[%s3805_s0 + $0x144] ss:$16 sps:$4 sm:$0xff]   ;;  %v3033_v9 = vld [vmem:[%s3805_s0 + $0x188] ss:$16 sps:$4 sm:$0xff]  }
  0x62   :  { %1253 = vmatprep.mubr.bf16.mxu0 %v2992_v52  ;;  %v3037_v10 = vld [vmem:[%s3805_s0 + $0x1ac] ss:$16 sps:$4 sm:$0xff]   ;;  %v3024_v11 = vld [vmem:[%s3805_s0 + $0x140] ss:$16 sps:$4 sm:$0xff]   ;;  %v3028_v12 = vld [vmem:[%s3805_s0 + $0x164] ss:$16 sps:$4 sm:$0xff]  }
  0x63   :  { %v3039_v13 = vld [vmem:[%s3805_s0 + $0x1a8] ss:$16 sps:$4 sm:$0xff]   ;;  %v3043_v14 = vld [vmem:[%s3805_s0 + $0x1cc] ss:$16 sps:$4 sm:$0xff]   ;;  %v3030_v15 = vld [vmem:[%s3805_s0 + $0x160] ss:$16 sps:$4 sm:$0xff]  }
  0x64   :  { %v3034_v16 = vld [vmem:[%s3805_s0 + $0x184] ss:$16 sps:$4 sm:$0xff]   ;;  %v3045_v17 = vld [vmem:[%s3805_s0 + $0x1c8] ss:$16 sps:$4 sm:$0xff]   ;;  %v3049_v18 = vld [vmem:[%s3805_s0 + $0x1ec] ss:$16 sps:$4 sm:$0xff]  }
  0x65   :  { %v3036_v19 = vld [vmem:[%s3805_s0 + $0x180] ss:$16 sps:$4 sm:$0xff]   ;;  %v3040_v20 = vld [vmem:[%s3805_s0 + $0x1a4] ss:$16 sps:$4 sm:$0xff]   ;;  %v3051_v21 = vld [vmem:[%s3805_s0 + $0x1e8] ss:$16 sps:$4 sm:$0xff]  }
  0x66   :  { %1567 = vmatmul.mubr.bf16.gmra.mxu1 %v3009_v57  ;;  %v3055_v22 = vld [vmem:[%s3805_s0 + $0x20c] ss:$16 sps:$4 sm:$0xff]   ;;  %v3042_v23 = vld [vmem:[%s3805_s0 + $0x1a0] ss:$16 sps:$4 sm:$0xff]   ;;  %v3046_v24 = vld [vmem:[%s3805_s0 + $0x1c4] ss:$16 sps:$4 sm:$0xff]  }
  0x67   :  { %2587 = vmatprep.mubr.msk.bf16.mxu1 %vm1080_vm0, %v3013_v58  ;;  %v3057_v25 = vld [vmem:[%s3805_s0 + $0x208] ss:$16 sps:$4 sm:$0xff]   ;;  %v3061_v26 = vld [vmem:[%s3805_s0 + $0x22c] ss:$16 sps:$4 sm:$0xff]   ;;  %v3048_v27 = vld [vmem:[%s3805_s0 + $0x1c0] ss:$16 sps:$4 sm:$0xff]  }
  0x68   :  { %v3052_v28 = vld [vmem:[%s3805_s0 + $0x1e4] ss:$16 sps:$4 sm:$0xff]   ;;  %v3063_v29 = vld [vmem:[%s3805_s0 + $0x228] ss:$16 sps:$4 sm:$0xff]   ;;  %v3067_v30 = vld [vmem:[%s3805_s0 + $0x24c] ss:$16 sps:$4 sm:$0xff]  }
  0x69   :  { %1254 = vmatmul.mubr.bf16.gmra.mxu0 %v2994_v55  ;;  %v3054_v31 = vld [vmem:[%s3805_s0 + $0x1e0] ss:$16 sps:$4 sm:$0xff]   ;;  %v3058_v32 = vld [vmem:[%s3805_s0 + $0x204] ss:$16 sps:$4 sm:$0xff]   ;;  %v3069_v33 = vld [vmem:[%s3805_s0 + $0x248] ss:$16 sps:$4 sm:$0xff]  }
  0x6a   :  { %1261 = vmatprep.mubr.bf16.mxu0 %v2998_v56  ;;  %v3073_v34 = vld [vmem:[%s3805_s0 + $0x26c] ss:$16 sps:$4 sm:$0xff]   ;;  %v3060_v35 = vld [vmem:[%s3805_s0 + $0x200] ss:$16 sps:$4 sm:$0xff]   ;;  %v3064_v36 = vld [vmem:[%s3805_s0 + $0x224] ss:$16 sps:$4 sm:$0xff]  }
  0x6b   :  { %v3075_v37 = vld [vmem:[%s3805_s0 + $0x268] ss:$16 sps:$4 sm:$0xff]   ;;  %v3079_v38 = vld [vmem:[%s3805_s0 + $0x28c] ss:$16 sps:$4 sm:$0xff]   ;;  %v3066_v39 = vld [vmem:[%s3805_s0 + $0x220] ss:$16 sps:$4 sm:$0xff]  }
  0x6c   :  { %v3070_v40 = vld [vmem:[%s3805_s0 + $0x244] ss:$16 sps:$4 sm:$0xff]   ;;  %v3081_v41 = vld [vmem:[%s3805_s0 + $0x288] ss:$16 sps:$4 sm:$0xff]   ;;  %v3085_v42 = vld [vmem:[%s3805_s0 + $0x2ac] ss:$16 sps:$4 sm:$0xff]  }
  0x6d   :  { %v3072_v43 = vld [vmem:[%s3805_s0 + $0x240] ss:$16 sps:$4 sm:$0xff]   ;;  %v3076_v44 = vld [vmem:[%s3805_s0 + $0x264] ss:$16 sps:$4 sm:$0xff]   ;;  %v3087_v45 = vld [vmem:[%s3805_s0 + $0x2a8] ss:$16 sps:$4 sm:$0xff]  }
  0x6e   :  { %1575 = vmatmul.mubr.bf16.gmra.mxu1 %v3015_v61  ;;  %v3091_v46 = vld [vmem:[%s3805_s0 + $0x2cc] ss:$16 sps:$4 sm:$0xff]   ;;  %v3078_v47 = vld [vmem:[%s3805_s0 + $0x260] ss:$16 sps:$4 sm:$0xff]   ;;  %v3082_v48 = vld [vmem:[%s3805_s0 + $0x284] ss:$16 sps:$4 sm:$0xff]  }
  0x6f   :  { %2588 = vmatprep.mubr.msk.bf16.mxu1 %vm1080_vm0, %v3019_v62  ;;  %v3093_v49 = vld [vmem:[%s3805_s0 + $0x2c8] ss:$16 sps:$4 sm:$0xff]   ;;  %v3097_v50 = vld [vmem:[%s3805_s0 + $0x2ec] ss:$16 sps:$4 sm:$0xff]   ;;  %v3084_v51 = vld [vmem:[%s3805_s0 + $0x280] ss:$16 sps:$4 sm:$0xff]  }
  0x70   :  { %v3088_v52 = vld [vmem:[%s3805_s0 + $0x2a4] ss:$16 sps:$4 sm:$0xff]   ;;  %v3099_v53 = vld [vmem:[%s3805_s0 + $0x2e8] ss:$16 sps:$4 sm:$0xff]   ;;  %v3103_v54 = vld [vmem:[%s3805_s0 + $0x30c] ss:$16 sps:$4 sm:$0xff]  }
  0x71   :  { %1262 = vmatmul.mubr.bf16.gmra.mxu0 %v3000_v59  ;;  %v3090_v55 = vld [vmem:[%s3805_s0 + $0x2a0] ss:$16 sps:$4 sm:$0xff]   ;;  %v3094_v56 = vld [vmem:[%s3805_s0 + $0x2c4] ss:$16 sps:$4 sm:$0xff]   ;;  %v3105_v57 = vld [vmem:[%s3805_s0 + $0x308] ss:$16 sps:$4 sm:$0xff]  }
  0x72   :  { %1269 = vmatprep.mubr.bf16.mxu0 %v3004_v60  ;;  %v3109_v58 = vld [vmem:[%s3805_s0 + $0x32c] ss:$16 sps:$4 sm:$0xff]   ;;  %v3096_v60 = vld [vmem:[%s3805_s0 + $0x2c0] ss:$16 sps:$4 sm:$0xff]   ;;  %v3100_v62 = vld [vmem:[%s3805_s0 + $0x2e4] ss:$16 sps:$4 sm:$0xff]  }
  0x76   :  { %1583 = vmatmul.mubr.bf16.gmra.mxu1 %v3021_v1  ;;  %v3115_v1 = vld [vmem:[%s3805_s0 + $0x34c] ss:$16 sps:$4 sm:$0xff]  }
  0x77   :  { %2589 = vmatprep.mubr.msk.bf16.mxu1 %vm1080_vm0, %v3025_v2 }
  0x79   :  { %1270 = vmatmul.mubr.bf16.gmra.mxu0 %v3006_v63 }
  0x7a   :  { %1277 = vmatprep.mubr.bf16.mxu0 %v3010_v0  ;;  %v3111_v0 = vld [vmem:[%s3805_s0 + $0x328] ss:$16 sps:$4 sm:$0xff]  }
  0x7e   :  { %1591 = vmatmul.mubr.bf16.gmra.mxu1 %v3027_v5 }
  0x7f   :  { %2590 = vmatprep.mubr.msk.bf16.mxu1 %vm1080_vm0, %v3031_v6  ;;  %v3106_v6 = vld [vmem:[%s3805_s0 + $0x304] ss:$16 sps:$4 sm:$0xff]  }
  0x81   :  { %1278 = vmatmul.mubr.bf16.gmra.mxu0 %v3012_v3 }
  0x82   :  { %1285 = vmatprep.mubr.bf16.mxu0 %v3016_v4  ;;  %v3102_v4 = vld [vmem:[%s3805_s0 + $0x2e0] ss:$16 sps:$4 sm:$0xff]  }
  0x86   :  { %1599 = vmatmul.mubr.bf16.gmra.mxu1 %v3033_v9  ;;  %v3121_v9 = vld [vmem:[%s3805_s0 + $0x36c] ss:$16 sps:$4 sm:$0xff]  }
  0x87   :  { %2591 = vmatprep.mubr.msk.bf16.mxu1 %vm1080_vm0, %v3037_v10 }
  0x89   :  { %1286 = vmatmul.mubr.bf16.gmra.mxu0 %v3018_v7 }
  0x8a   :  { %1293 = vmatprep.mubr.bf16.mxu0 %v3022_v8  ;;  %v3117_v8 = vld [vmem:[%s3805_s0 + $0x348] ss:$16 sps:$4 sm:$0xff]  }
  0x8e   :  { %1607 = vmatmul.mubr.bf16.gmra.mxu1 %v3039_v13 }
  0x8f   :  { %2592 = vmatprep.mubr.msk.bf16.mxu1 %vm1080_vm0, %v3043_v14  ;;  %v3112_v14 = vld [vmem:[%s3805_s0 + $0x324] ss:$16 sps:$4 sm:$0xff]  }
  0x91   :  { %1294 = vmatmul.mubr.bf16.gmra.mxu0 %v3024_v11 }
  0x92   :  { %1301 = vmatprep.mubr.bf16.mxu0 %v3028_v12  ;;  %v3108_v12 = vld [vmem:[%s3805_s0 + $0x300] ss:$16 sps:$4 sm:$0xff]  }
  0x96   :  { %1615 = vmatmul.mubr.bf16.gmra.mxu1 %v3045_v17  ;;  %v3127_v17 = vld [vmem:[%s3805_s0 + $0x38c] ss:$16 sps:$4 sm:$0xff]  }
  0x97   :  { %2593 = vmatprep.mubr.msk.bf16.mxu1 %vm1080_vm0, %v3049_v18 }
  0x99   :  { %1302 = vmatmul.mubr.bf16.gmra.mxu0 %v3030_v15 }
  0x9a   :  { %1309 = vmatprep.mubr.bf16.mxu0 %v3034_v16  ;;  %v3123_v16 = vld [vmem:[%s3805_s0 + $0x368] ss:$16 sps:$4 sm:$0xff]  }
  0x9e   :  { %1623 = vmatmul.mubr.bf16.gmra.mxu1 %v3051_v21  ;;  %v3655_v21 = vld [vmem:[%s3807_s2] ss:$0 sm:$0xff] }
  0x9f   :  { %2594 = vmatprep.mubr.msk.bf16.mxu1 %vm1080_vm0, %v3055_v22 }
  0xa1   :  { %1310 = vmatmul.mubr.bf16.gmra.mxu0 %v3036_v19 }
  0xa2   :  { %1317 = vmatprep.mubr.bf16.mxu0 %v3040_v20 }
  0xa6   :  { %1631 = vmatmul.mubr.bf16.gmra.mxu1 %v3057_v25  ;;  %v3114_v25 = vld [vmem:[%s3805_s0 + $0x320] ss:$16 sps:$4 sm:$0xff]  }
  0xa7   :  { %2595 = vmatprep.mubr.msk.bf16.mxu1 %vm1080_vm0, %v3061_v26 }
  0xa9   :  { %1318 = vmatmul.mubr.bf16.gmra.mxu0 %v3042_v23 }
  0xaa   :  { %1325 = vmatprep.mubr.bf16.mxu0 %v3046_v24 }
  0xae   :  { %1639 = vmatmul.mubr.bf16.gmra.mxu1 %v3063_v29  ;;  %v3118_v29 = vld [vmem:[%s3805_s0 + $0x344] ss:$16 sps:$4 sm:$0xff]  }
  0xaf   :  { %2596 = vmatprep.mubr.msk.bf16.mxu1 %vm1080_vm0, %v3067_v30 }
  0xb1   :  { %1326 = vmatmul.mubr.bf16.gmra.mxu0 %v3048_v27 }
  0xb2   :  { %1333 = vmatprep.mubr.bf16.mxu0 %v3052_v28 }
  0xb6   :  { %1647 = vmatmul.mubr.bf16.gmra.mxu1 %v3069_v33 }
  0xb7   :  { %2597 = vmatprep.mubr.msk.bf16.mxu1 %vm1080_vm0, %v3073_v34  ;;  %v3133_v34 = vld [vmem:[%s3805_s0 + $0x3ac] ss:$16 sps:$4 sm:$0xff]  }
  0xb9   :  { %1334 = vmatmul.mubr.bf16.gmra.mxu0 %v3054_v31 }
  0xba   :  { %1341 = vmatprep.mubr.bf16.mxu0 %v3058_v32  ;;  %v3129_v32 = vld [vmem:[%s3805_s0 + $0x388] ss:$16 sps:$4 sm:$0xff]  }
  0xbe   :  { %1655 = vmatmul.mubr.bf16.gmra.mxu1 %v3075_v37 }
  0xbf   :  { %2598 = vmatprep.mubr.msk.bf16.mxu1 %vm1080_vm0, %v3079_v38 }
  0xc1   :  { %1342 = vmatmul.mubr.bf16.gmra.mxu0 %v3060_v35 }
  0xc2   :  { %1349 = vmatprep.mubr.bf16.mxu0 %v3064_v36 }
  0xc6   :  { %1663 = vmatmul.mubr.bf16.gmra.mxu1 %v3081_v41 }
  0xc7   :  { %2599 = vmatprep.mubr.msk.bf16.mxu1 %vm1080_vm0, %v3085_v42 }
  0xc9   :  { %1350 = vmatmul.mubr.bf16.gmra.mxu0 %v3066_v39 }
  0xca   :  { %1357 = vmatprep.mubr.bf16.mxu0 %v3070_v40 }
  0xce   :  { %1671 = vmatmul.mubr.bf16.gmra.mxu1 %v3087_v45 }
  0xcf   :  { %2600 = vmatprep.mubr.msk.bf16.mxu1 %vm1080_vm0, %v3091_v46 }
  0xd1   :  { %1358 = vmatmul.mubr.bf16.gmra.mxu0 %v3072_v43 }
  0xd2   :  { %1365 = vmatprep.mubr.bf16.mxu0 %v3076_v44  ;;  %v3120_v44 = vld [vmem:[%s3805_s0 + $0x340] ss:$16 sps:$4 sm:$0xff]  }
  0xd6   :  { %1679 = vmatmul.mubr.bf16.gmra.mxu1 %v3093_v49 }
  0xd7   :  { %2601 = vmatprep.mubr.msk.bf16.mxu1 %vm1080_vm0, %v3097_v50 }
  0xd9   :  { %1366 = vmatmul.mubr.bf16.gmra.mxu0 %v3078_v47 }
  0xda   :  { %1373 = vmatprep.mubr.bf16.mxu0 %v3082_v48  ;;  %v3124_v48 = vld [vmem:[%s3805_s0 + $0x364] ss:$16 sps:$4 sm:$0xff]  }
  0xde   :  { %1687 = vmatmul.mubr.bf16.gmra.mxu1 %v3099_v53  ;;  %v3139_v53 = vld [vmem:[%s3805_s0 + $0x3cc] ss:$16 sps:$4 sm:$0xff]  }
  0xdf   :  { %2602 = vmatprep.mubr.msk.bf16.mxu1 %vm1080_vm0, %v3103_v54 }
  0xe1   :  { %1374 = vmatmul.mubr.bf16.gmra.mxu0 %v3084_v51  ;;  %v3135_v51 = vld [vmem:[%s3805_s0 + $0x3a8] ss:$16 sps:$4 sm:$0xff]  }
  0xe2   :  { %1381 = vmatprep.mubr.bf16.mxu0 %v3088_v52 }
  0xe6   :  { %v1504_v59 = vpop.f32.mrf.mxu1  ;;  %1695 = vmatmul.mubr.bf16.gmra.mxu1 %v3105_v57 }
  0xe7   :  { %2603 = vmatprep.mubr.msk.bf16.mxu1 %vm1080_vm0, %v3109_v58 }
  0xe8   :  { %v1506_v61 = vpop.f32.mrf.mxu1 }
  0xe9   :  { %1382 = vmatmul.mubr.bf16.gmra.mxu0 %v3090_v55 }
  0xea   :  { %1389 = vmatprep.mubr.bf16.mxu0 %v3094_v56  ;;  %v1507_v63 = vpop.f32.mrf.mxu1 }
  0xec   :  { %v1509_v2 = vpop.f32.mrf.mxu1 }
  0xee   :  { %v1512_v3 = vpop.f32.mrf.mxu1  ;;  %1703 = vmatmul.mubr.bf16.gmra.mxu1 %v3111_v0 }
  0xef   :  { %2604 = vmatprep.mubr.msk.bf16.mxu1 %vm1080_vm0, %v3115_v1 }
  0xf0   :  { %v1514_v5 = vpop.f32.mrf.mxu1 }
  0xf1   :  { %1390 = vmatmul.mubr.bf16.gmra.mxu0 %v3096_v60 }
  0xf2   :  { %1397 = vmatprep.mubr.bf16.mxu0 %v3100_v62  ;;  %v1515_v7 = vpop.f32.mrf.mxu1 }
  0xf4   :  { %v1517_v10 = vpop.f32.mrf.mxu1 }
  0xf6   :  { %v1520_v11 = vpop.f32.mrf.mxu1  ;;  %1711 = vmatmul.mubr.bf16.gmra.mxu1 %v3117_v8  ;;  %v3145_v8 = vld [vmem:[%s3805_s0 + $0x3ec] ss:$16 sps:$4 sm:$0xff]  }
  0xf7   :  { %2605 = vmatprep.mubr.msk.bf16.mxu1 %vm1080_vm0, %v3121_v9 }
  0xf8   :  { %v1522_v13 = vpop.f32.mrf.mxu1 }
  0xf9   :  { %1398 = vmatmul.mubr.bf16.gmra.mxu0 %v3102_v4 }
  0xfa   :  { %1405 = vmatprep.mubr.bf16.mxu0 %v3106_v6  ;;  %v3644_v15 = vpop.f32.mrf.mxu1  ;;  %v3141_v6 = vld [vmem:[%s3805_s0 + $0x3c8] ss:$16 sps:$4 sm:$0xff]  }
  0xfc   :  { %v1525_v19 = vpop.f32.mrf.mxu1 }
  0xfe   :  { %v3657_v23 = vpop.f32.mrf.mxu1  ;;  %1719 = vmatmul.mubr.bf16.gmra.mxu1 %v3123_v16 }
  0xff   :  { %2606 = vmatprep.mubr.msk.bf16.mxu1 %vm1080_vm0, %v3127_v17 }
 0x100   :  { %v1530_v26 = vpop.f32.mrf.mxu1 }
 0x101   :  { %v1215_v18 = vpop.f32.mrf.mxu0  ;;  %1406 = vmatmul.mubr.bf16.gmra.mxu0 %v3108_v12  ;;  %v3147_v26 = vld [vmem:[%s3805_s0 + $0x3e8] ss:$16 sps:$4 sm:$0xff]  }
 0x102   :  { %v1505_v20 = vadd.f32 %v1504_v59, %v1215_v18  ;;  %1413 = vmatprep.mubr.bf16.mxu0 %v3112_v14  ;;  %v3667_v31 = vpop.f32.mrf.mxu1  ;;  %v3130_v18 = vld [vmem:[%s3805_s0 + $0x380] ss:$16 sps:$4 sm:$0xff]  }
 0x103   :  { %v1217_v22 = vpop.f32.mrf.mxu0 }
 0x104   :  { %v1961_v27 = vadd.f32 %v3655_v21, %v1505_v20  ;;  %v1533_v36 = vpop.f32.mrf.mxu1 }
 0x105   :  { %v1218_v24 = vpop.f32.mrf.mxu0 }
 0x106   :  { %v1508_v28 = vadd.f32 %v1507_v63, %v1218_v24  ;;  %v2025_v37 = vmax.f32 %v1961_v27, 0.0  ;;  %v3676_v41 = vpop.f32.mrf.mxu1  ;;  %1727 = vmatmul.mubr.bf16.gmra.mxu1 %v3129_v32  ;;  %v3126_v63 = vld [vmem:[%s3805_s0 + $0x360] ss:$16 sps:$4 sm:$0xff]  }
 0x107   :  { %v1220_v30 = vpop.f32.mrf.mxu0  ;;  %2607 = vmatprep.mubr.msk.bf16.mxu1 %vm1080_vm0, %v3133_v34 }
 0x108   :  { %v1962_v33 = vadd.f32 %v3655_v21, %v1508_v28  ;;  %v1538_v45 = vpop.f32.mrf.mxu1 }
 0x109   :  { %v1223_v35 = vpop.f32.mrf.mxu0  ;;  %1414 = vmatmul.mubr.bf16.gmra.mxu0 %v3114_v25 }
 0x10a   :  { %v2026_v38 = vmax.f32 %v1962_v33, 0.0  ;;  %v1513_v39 = vadd.f32 %v1512_v3, %v1223_v35  ;;  %1421 = vmatprep.mubr.bf16.mxu0 %v3118_v29  ;;  %v3686_v50 = vpop.f32.mrf.mxu1  ;;  %v3132_v3 = vld [vmem:[%s3805_s0 + $0x384] ss:$16 sps:$4 sm:$0xff]  }
 0x10b   :  { %v1225_v40 = vpop.f32.mrf.mxu0 }
 0x10c   :  { %v2742_v42 = vpack.c.bf16 %v2026_v38, %v2025_v37  ;;  %v1963_v46 = vadd.f32 %v3655_v21, %v1513_v39  ;;  %v1541_v55 = vpop.f32.mrf.mxu1  ;;  %v3136_v37 = vld [vmem:[%s3805_s0 + $0x3a0] ss:$16 sps:$4 sm:$0xff]  }
 0x10d   :  { %v1226_v43 = vpop.f32.mrf.mxu0 }
 0x10e   :  { %2743 = vst [vmem:[#allocation3] sm:$0xff] %v2742_v42   ;;  %v1516_v47 = vadd.f32 %v1515_v7, %v1226_v43  ;;  %v2027_v56 = vmax.f32 %v1963_v46, 0.0  ;;  %v3695_v60 = vpop.f32.mrf.mxu1  ;;  %1735 = vmatmul.mubr.bf16.gmra.mxu1 %v3135_v51 }
 0x10f   :  { %v1228_v49 = vpop.f32.mrf.mxu0  ;;  %2608 = vmatprep.mubr.msk.bf16.mxu1 %vm1080_vm0, %v3139_v53 }
 0x110   :  { %v1964_v52 = vadd.f32 %v3655_v21, %v1516_v47  ;;  %v1546_v0 = vpop.f32.mrf.mxu1 }
 0x111   :  { %v1231_v54 = vpop.f32.mrf.mxu0  ;;  %1422 = vmatmul.mubr.bf16.gmra.mxu0 %v3120_v44 }
 0x112   :  { %v2028_v57 = vmax.f32 %v1964_v52, 0.0  ;;  %v1521_v58 = vadd.f32 %v1520_v11, %v1231_v54  ;;  %1429 = vmatprep.mubr.bf16.mxu0 %v3124_v48  ;;  %v3706_v5 = vpop.f32.mrf.mxu1  ;;  %v3142_v54 = vld [vmem:[%s3805_s0 + $0x3c0] ss:$16 sps:$4 sm:$0xff]  }
 0x113   :  { %v1233_v59 = vpop.f32.mrf.mxu0 }
 0x114   :  { %v2747_v61 = vpack.c.bf16 %v2028_v57, %v2027_v56  ;;  %v1965_v1 = vadd.f32 %v3655_v21, %v1521_v58  ;;  %v1549_v10 = vpop.f32.mrf.mxu1  ;;  %v3150_v58 = vld [vmem:[%s3805_s0 + $0x3e4] ss:$16 sps:$4 sm:$0xff]  }
 0x115   :  { %v1234_v62 = vpop.f32.mrf.mxu0 }
 0x116   :  { %2899 = vst [vmem:[#allocation3 + $0x8] sm:$0xff] %v2747_v61   ;;  %v1524_v2 = vadd.f32 %v3644_v15, %v1234_v62  ;;  %v2029_v11 = vmax.f32 %v1965_v1, 0.0  ;;  %v1552_v15 = vpop.f32.mrf.mxu1  ;;  %1743 = vmatmul.mubr.bf16.gmra.mxu1 %v3141_v6 }
 0x117   :  { %v1236_v4 = vpop.f32.mrf.mxu0  ;;  %2609 = vmatprep.mubr.msk.bf16.mxu1 %vm1080_vm0, %v3145_v8 }
 0x118   :  { %v1966_v7 = vadd.f32 %v3655_v21, %v1524_v2  ;;  %v1554_v19 = vpop.f32.mrf.mxu1 }
 0x119   :  { %v1239_v9 = vpop.f32.mrf.mxu0  ;;  %1430 = vmatmul.mubr.bf16.gmra.mxu0 %v3126_v63 }
 0x11a   :  { %v2030_v12 = vmax.f32 %v1966_v7, 0.0  ;;  %v1529_v13 = vadd.f32 %v3657_v23, %v1239_v9  ;;  %1437 = vmatprep.mubr.bf16.mxu0 %v3132_v3  ;;  %v3138_v23 = vld [vmem:[%s3805_s0 + $0x3a4] ss:$16 sps:$4 sm:$0xff]   ;;  %v1555_v25 = vpop.f32.mrf.mxu1 }
 0x11b   :  { %v1241_v14 = vpop.f32.mrf.mxu0 }
 0x11c   :  { %v2752_v16 = vpack.c.bf16 %v2030_v12, %v2029_v11  ;;  %v1967_v20 = vadd.f32 %v3655_v21, %v1529_v13  ;;  %v1557_v29 = vpop.f32.mrf.mxu1 }
 0x11d   :  { %v1242_v17 = vpop.f32.mrf.mxu0 }
 0x11e   :  { %2900 = vst [vmem:[#allocation3 + $0x10] sm:$0xff] %v2752_v16   ;;  %v1532_v22 = vadd.f32 %v3667_v31, %v1242_v17  ;;  %v2031_v30 = vmax.f32 %v1967_v20, 0.0  ;;  %v1560_v34 = vpop.f32.mrf.mxu1  ;;  %1751 = vmatmul.mubr.bf16.gmra.mxu1 %v3147_v26 }
 0x11f   :  { %v1244_v24 = vpop.f32.mrf.mxu0 }
 0x120   :  { %v1968_v27 = vadd.f32 %v3655_v21, %v1532_v22  ;;  %v1562_v38 = vpop.f32.mrf.mxu1 }
 0x121   :  { %v1247_v28 = vpop.f32.mrf.mxu0  ;;  %1438 = vmatmul.mubr.bf16.gmra.mxu0 %v3130_v18 }
 0x122   :  { %v2032_v32 = vmax.f32 %v1968_v27, 0.0  ;;  %v1537_v33 = vadd.f32 %v3676_v41, %v1247_v28  ;;  %1445 = vmatprep.mubr.bf16.mxu0 %v3138_v23  ;;  %v3144_v41 = vld [vmem:[%s3805_s0 + $0x3c4] ss:$16 sps:$4 sm:$0xff]   ;;  %v1563_v43 = vpop.f32.mrf.mxu1 }
 0x123   :  { %v1249_v31 = vpop.f32.mrf.mxu0 }
 0x124   :  { %v2757_v35 = vpack.c.bf16 %v2032_v32, %v2031_v30  ;;  %v1969_v39 = vadd.f32 %v3655_v21, %v1537_v33  ;;  %v1565_v46 = vpop.f32.mrf.mxu1 }
 0x125   :  { %v1250_v36 = vpop.f32.mrf.mxu0 }
 0x126   :  { %2901 = vst [vmem:[#allocation3 + $0x18] sm:$0xff] %v2757_v35   ;;  %v1540_v40 = vadd.f32 %v3686_v50, %v1250_v36  ;;  %v2033_v47 = vmax.f32 %v1969_v39, 0.0  ;;  %v1568_v52 = vpop.f32.mrf.mxu1 }
 0x127   :  { %v1252_v42 = vpop.f32.mrf.mxu0 }
 0x128   :  { %v1970_v44 = vadd.f32 %v3655_v21, %v1540_v40  ;;  %v1570_v55 = vpop.f32.mrf.mxu1 }
 0x129   :  { %v1255_v45 = vpop.f32.mrf.mxu0  ;;  %1446 = vmatmul.mubr.bf16.gmra.mxu0 %v3136_v37 }
 0x12a   :  { %v2034_v48 = vmax.f32 %v1970_v44, 0.0  ;;  %v1545_v49 = vadd.f32 %v3695_v60, %v1255_v45  ;;  %1453 = vmatprep.mubr.bf16.mxu0 %v3144_v41  ;;  %v1571_v60 = vpop.f32.mrf.mxu1 }
 0x12b   :  { %v1257_v51 = vpop.f32.mrf.mxu0 }
 0x12c   :  { %v2762_v53 = vpack.c.bf16 %v2034_v48, %v2033_v47  ;;  %v1971_v56 = vadd.f32 %v3655_v21, %v1545_v49  ;;  %v1573_v63 = vpop.f32.mrf.mxu1 }
 0x12d   :  { %v1258_v50 = vpop.f32.mrf.mxu0 }
 0x12e   :  { %2902 = vst [vmem:[#allocation3 + $0x20] sm:$0xff] %v2762_v53   ;;  %v1548_v57 = vadd.f32 %v3706_v5, %v1258_v50  ;;  %v2035_v0 = vmax.f32 %v1971_v56, 0.0  ;;  %v1576_v4 = vpop.f32.mrf.mxu1  ;;  %v3148_v5 = vld [vmem:[%s3805_s0 + $0x3e0] ss:$16 sps:$4 sm:$0xff]  }
 0x12f   :  { %v1260_v59 = vpop.f32.mrf.mxu0 }
 0x130   :  { %v1972_v61 = vadd.f32 %v3655_v21, %v1548_v57  ;;  %v1578_v8 = vpop.f32.mrf.mxu1 }
 0x131   :  { %v1263_v62 = vpop.f32.mrf.mxu0  ;;  %1454 = vmatmul.mubr.bf16.gmra.mxu0 %v3142_v54 }
 0x132   :  { %v2036_v1 = vmax.f32 %v1972_v61, 0.0  ;;  %v1553_v2 = vadd.f32 %v1552_v15, %v1263_v62  ;;  %1461 = vmatprep.mubr.bf16.mxu0 %v3150_v58  ;;  %v1579_v12 = vpop.f32.mrf.mxu1 }
 0x133   :  { %v1265_v3 = vpop.f32.mrf.mxu0 }
 0x134   :  { %v2767_v6 = vpack.c.bf16 %v2036_v1, %v2035_v0  ;;  %v1973_v9 = vadd.f32 %v3655_v21, %v1553_v2  ;;  %v1581_v15 = vpop.f32.mrf.mxu1 }
 0x135   :  { %v1266_v7 = vpop.f32.mrf.mxu0 }
 0x136   :  { %2903 = vst [vmem:[#allocation3 + $0x28] sm:$0xff] %v2767_v6   ;;  %v1556_v10 = vadd.f32 %v1555_v25, %v1266_v7  ;;  %v2037_v16 = vmax.f32 %v1973_v9, 0.0  ;;  %v1584_v20 = vpop.f32.mrf.mxu1 }
 0x137   :  { %v1268_v11 = vpop.f32.mrf.mxu0 }
 0x138   :  { %v1974_v13 = vadd.f32 %v3655_v21, %v1556_v10  ;;  %v1586_v24 = vpop.f32.mrf.mxu1 }
 0x139   :  { %v1271_v14 = vpop.f32.mrf.mxu0  ;;  %1462 = vmatmul.mubr.bf16.gmra.mxu0 %v3148_v5 }
 0x13a   :  { %v2038_v17 = vmax.f32 %v1974_v13, 0.0  ;;  %v1561_v18 = vadd.f32 %v1560_v34, %v1271_v14  ;;  %v1587_v28 = vpop.f32.mrf.mxu1 }
 0x13b   :  { %v1273_v19 = vpop.f32.mrf.mxu0 }
 0x13c   :  { %v2772_v22 = vpack.c.bf16 %v2038_v17, %v2037_v16  ;;  %v1975_v26 = vadd.f32 %v3655_v21, %v1561_v18  ;;  %v1589_v32 = vpop.f32.mrf.mxu1 }
 0x13d   :  { %v1274_v23 = vpop.f32.mrf.mxu0 }
 0x13e   :  { %2904 = vst [vmem:[#allocation3 + $0x30] sm:$0xff] %v2772_v22   ;;  %v1564_v27 = vadd.f32 %v1563_v43, %v1274_v23  ;;  %v2039_v33 = vmax.f32 %v1975_v26, 0.0  ;;  %v1592_v34 = vpop.f32.mrf.mxu1 }
 0x13f   :  { %v1276_v25 = vpop.f32.mrf.mxu0 }
 0x140   :  { %v1976_v29 = vadd.f32 %v3655_v21, %v1564_v27  ;;  %v1594_v39 = vpop.f32.mrf.mxu1 }
 0x141   :  { %v1279_v30 = vpop.f32.mrf.mxu0 }
 0x142   :  { %v2040_v31 = vmax.f32 %v1976_v29, 0.0  ;;  %v1569_v35 = vadd.f32 %v1568_v52, %v1279_v30  ;;  %v1595_v43 = vpop.f32.mrf.mxu1 }
 0x143   :  { %v1281_v36 = vpop.f32.mrf.mxu0 }
 0x144   :  { %v2777_v37 = vpack.c.bf16 %v2040_v31, %v2039_v33  ;;  %v1977_v40 = vadd.f32 %v3655_v21, %v1569_v35  ;;  %v1597_v46 = vpop.f32.mrf.mxu1 }
 0x145   :  { %v1282_v38 = vpop.f32.mrf.mxu0 }
 0x146   :  { %2905 = vst [vmem:[#allocation3 + $0x38] sm:$0xff] %v2777_v37   ;;  %v1572_v41 = vadd.f32 %v1571_v60, %v1282_v38  ;;  %v2041_v47 = vmax.f32 %v1977_v40, 0.0  ;;  %v1600_v52 = vpop.f32.mrf.mxu1 }
 0x147   :  { %v1284_v42 = vpop.f32.mrf.mxu0 }
 0x148   :  { %v1978_v44 = vadd.f32 %v3655_v21, %v1572_v41  ;;  %v1602_v54 = vpop.f32.mrf.mxu1 }
 0x149   :  { %v1287_v45 = vpop.f32.mrf.mxu0 }
 0x14a   :  { %v2042_v48 = vmax.f32 %v1978_v44, 0.0  ;;  %v1577_v49 = vadd.f32 %v1576_v4, %v1287_v45  ;;  %v1603_v58 = vpop.f32.mrf.mxu1 }
 0x14b   :  { %v1289_v51 = vpop.f32.mrf.mxu0 }
 0x14c   :  { %v2782_v53 = vpack.c.bf16 %v2042_v48, %v2041_v47  ;;  %v1979_v55 = vadd.f32 %v3655_v21, %v1577_v49  ;;  %v1605_v61 = vpop.f32.mrf.mxu1 }
 0x14d   :  { %v1290_v50 = vpop.f32.mrf.mxu0 }
 0x14e   :  { %2906 = vst [vmem:[#allocation3 + $0x40] sm:$0xff] %v2782_v53   ;;  %v1580_v56 = vadd.f32 %v1579_v12, %v1290_v50  ;;  %v2043_v62 = vmax.f32 %v1979_v55, 0.0  ;;  %v1608_v2 = vpop.f32.mrf.mxu1 }
 0x14f   :  { %v1292_v57 = vpop.f32.mrf.mxu0 }
 0x150   :  { %v1980_v59 = vadd.f32 %v3655_v21, %v1580_v56  ;;  %v1610_v6 = vpop.f32.mrf.mxu1 }
 0x151   :  { %v1295_v60 = vpop.f32.mrf.mxu0 }
 0x152   :  { %v2044_v63 = vmax.f32 %v1980_v59, 0.0  ;;  %v1585_v0 = vadd.f32 %v1584_v20, %v1295_v60  ;;  %v1611_v9 = vpop.f32.mrf.mxu1 }
 0x153   :  { %v1297_v1 = vpop.f32.mrf.mxu0 }
 0x154   :  { %v2787_v3 = vpack.c.bf16 %v2044_v63, %v2043_v62  ;;  %v1981_v7 = vadd.f32 %v3655_v21, %v1585_v0  ;;  %v1613_v12 = vpop.f32.mrf.mxu1 }
 0x155   :  { %v1298_v4 = vpop.f32.mrf.mxu0 }
 0x156   :  { %2907 = vst [vmem:[#allocation3 + $0x48] sm:$0xff] %v2787_v3   ;;  %v1588_v5 = vadd.f32 %v1587_v28, %v1298_v4  ;;  %v2045_v13 = vmax.f32 %v1981_v7, 0.0  ;;  %v1616_v17 = vpop.f32.mrf.mxu1 }
 0x157   :  { %v1300_v8 = vpop.f32.mrf.mxu0 }
 0x158   :  { %v1982_v10 = vadd.f32 %v3655_v21, %v1588_v5  ;;  %v1618_v20 = vpop.f32.mrf.mxu1 }
 0x159   :  { %v1303_v11 = vpop.f32.mrf.mxu0 }
 0x15a   :  { %v2046_v14 = vmax.f32 %v1982_v10, 0.0  ;;  %v1593_v15 = vadd.f32 %v1592_v34, %v1303_v11  ;;  %v1619_v26 = vpop.f32.mrf.mxu1 }
 0x15b   :  { %v1305_v16 = vpop.f32.mrf.mxu0 }
 0x15c   :  { %v2792_v18 = vpack.c.bf16 %v2046_v14, %v2045_v13  ;;  %v1983_v22 = vadd.f32 %v3655_v21, %v1593_v15  ;;  %v1621_v28 = vpop.f32.mrf.mxu1 }
 0x15d   :  { %v1306_v19 = vpop.f32.mrf.mxu0 }
 0x15e   :  { %2908 = vst [vmem:[#allocation3 + $0x50] sm:$0xff] %v2792_v18   ;;  %v1596_v23 = vadd.f32 %v1595_v43, %v1306_v19  ;;  %v2047_v29 = vmax.f32 %v1983_v22, 0.0  ;;  %v1624_v31 = vpop.f32.mrf.mxu1 }
 0x15f   :  { %v1308_v24 = vpop.f32.mrf.mxu0 }
 0x160   :  { %v1984_v27 = vadd.f32 %v3655_v21, %v1596_v23  ;;  %v1626_v34 = vpop.f32.mrf.mxu1 }
 0x161   :  { %v1311_v25 = vpop.f32.mrf.mxu0 }
 0x162   :  { %v2048_v30 = vmax.f32 %v1984_v27, 0.0  ;;  %v1601_v32 = vadd.f32 %v1600_v52, %v1311_v25  ;;  %v1627_v40 = vpop.f32.mrf.mxu1 }
 0x163   :  { %v1313_v33 = vpop.f32.mrf.mxu0 }
 0x164   :  { %v2797_v35 = vpack.c.bf16 %v2048_v30, %v2047_v29  ;;  %v1985_v37 = vadd.f32 %v3655_v21, %v1601_v32  ;;  %v1629_v43 = vpop.f32.mrf.mxu1 }
 0x165   :  { %v1314_v36 = vpop.f32.mrf.mxu0 }
 0x166   :  { %2909 = vst [vmem:[#allocation3 + $0x58] sm:$0xff] %v2797_v35   ;;  %v1604_v38 = vadd.f32 %v1603_v58, %v1314_v36  ;;  %v2049_v44 = vmax.f32 %v1985_v37, 0.0  ;;  %v1632_v48 = vpop.f32.mrf.mxu1 }
 0x167   :  { %v1316_v39 = vpop.f32.mrf.mxu0 }
 0x168   :  { %v1986_v41 = vadd.f32 %v3655_v21, %v1604_v38  ;;  %v1634_v52 = vpop.f32.mrf.mxu1 }
 0x169   :  { %v1319_v42 = vpop.f32.mrf.mxu0 }
 0x16a   :  { %v2050_v45 = vmax.f32 %v1986_v41, 0.0  ;;  %v1609_v46 = vadd.f32 %v1608_v2, %v1319_v42  ;;  %v1635_v55 = vpop.f32.mrf.mxu1 }
 0x16b   :  { %v1321_v47 = vpop.f32.mrf.mxu0 }
 0x16c   :  { %v2802_v49 = vpack.c.bf16 %v2050_v45, %v2049_v44  ;;  %v1987_v53 = vadd.f32 %v3655_v21, %v1609_v46  ;;  %v1637_v58 = vpop.f32.mrf.mxu1 }
 0x16d   :  { %v1322_v51 = vpop.f32.mrf.mxu0 }
 0x16e   :  { %2910 = vst [vmem:[#allocation3 + $0x60] sm:$0xff] %v2802_v49   ;;  %v1612_v50 = vadd.f32 %v1611_v9, %v1322_v51  ;;  %v2051_v59 = vmax.f32 %v1987_v53, 0.0  ;;  %v1640_v63 = vpop.f32.mrf.mxu1 }
 0x16f   :  { %v1324_v54 = vpop.f32.mrf.mxu0 }
 0x170   :  { %v1988_v56 = vadd.f32 %v3655_v21, %v1612_v50  ;;  %v1642_v2 = vpop.f32.mrf.mxu1 }
 0x171   :  { %v1327_v57 = vpop.f32.mrf.mxu0 }
 0x172   :  { %v2052_v60 = vmax.f32 %v1988_v56, 0.0  ;;  %v1617_v61 = vadd.f32 %v1616_v17, %v1327_v57  ;;  %v1643_v7 = vpop.f32.mrf.mxu1 }
 0x173   :  { %v1329_v62 = vpop.f32.mrf.mxu0 }
 0x174   :  { %v2807_v0 = vpack.c.bf16 %v2052_v60, %v2051_v59  ;;  %v1989_v3 = vadd.f32 %v3655_v21, %v1617_v61  ;;  %v1645_v9 = vpop.f32.mrf.mxu1 }
 0x175   :  { %v1330_v1 = vpop.f32.mrf.mxu0 }
 0x176   :  { %2911 = vst [vmem:[#allocation3 + $0x68] sm:$0xff] %v2807_v0   ;;  %v1620_v4 = vadd.f32 %v1619_v26, %v1330_v1  ;;  %v2053_v10 = vmax.f32 %v1989_v3, 0.0  ;;  %v1648_v14 = vpop.f32.mrf.mxu1 }
 0x177   :  { %v1332_v6 = vpop.f32.mrf.mxu0 }
 0x178   :  { %v1990_v5 = vadd.f32 %v3655_v21, %v1620_v4  ;;  %v1650_v17 = vpop.f32.mrf.mxu1 }
 0x179   :  { %v1335_v8 = vpop.f32.mrf.mxu0 }
 0x17a   :  { %v2054_v11 = vmax.f32 %v1990_v5, 0.0  ;;  %v1625_v12 = vadd.f32 %v1624_v31, %v1335_v8  ;;  %v1651_v22 = vpop.f32.mrf.mxu1 }
 0x17b   :  { %v1337_v13 = vpop.f32.mrf.mxu0 }
 0x17c   :  { %v2812_v15 = vpack.c.bf16 %v2054_v11, %v2053_v10  ;;  %v1991_v18 = vadd.f32 %v3655_v21, %v1625_v12  ;;  %v1653_v26 = vpop.f32.mrf.mxu1 }
 0x17d   :  { %v1338_v16 = vpop.f32.mrf.mxu0 }
 0x17e   :  { %2912 = vst [vmem:[#allocation3 + $0x70] sm:$0xff] %v2812_v15   ;;  %v1628_v19 = vadd.f32 %v1627_v40, %v1338_v16  ;;  %v2055_v27 = vmax.f32 %v1991_v18, 0.0  ;;  %v1656_v30 = vpop.f32.mrf.mxu1 }
 0x17f   :  { %v1340_v20 = vpop.f32.mrf.mxu0 }
 0x180   :  { %v1992_v23 = vadd.f32 %v3655_v21, %v1628_v19  ;;  %v1658_v31 = vpop.f32.mrf.mxu1 }
 0x181   :  { %v1343_v24 = vpop.f32.mrf.mxu0 }
 0x182   :  { %v2056_v25 = vmax.f32 %v1992_v23, 0.0  ;;  %v1633_v28 = vadd.f32 %v1632_v48, %v1343_v24  ;;  %v1659_v37 = vpop.f32.mrf.mxu1 }
 0x183   :  { %v1345_v29 = vpop.f32.mrf.mxu0 }
 0x184   :  { %v2817_v32 = vpack.c.bf16 %v2056_v25, %v2055_v27  ;;  %v1993_v35 = vadd.f32 %v3655_v21, %v1633_v28  ;;  %v1661_v40 = vpop.f32.mrf.mxu1 }
 0x185   :  { %v1346_v33 = vpop.f32.mrf.mxu0 }
 0x186   :  { %2913 = vst [vmem:[#allocation3 + $0x78] sm:$0xff] %v2817_v32   ;;  %v1636_v36 = vadd.f32 %v1635_v55, %v1346_v33  ;;  %v2057_v41 = vmax.f32 %v1993_v35, 0.0  ;;  %v1664_v45 = vpop.f32.mrf.mxu1 }
 0x187   :  { %v1348_v34 = vpop.f32.mrf.mxu0 }
 0x188   :  { %v1994_v38 = vadd.f32 %v3655_v21, %v1636_v36  ;;  %v1666_v48 = vpop.f32.mrf.mxu1 }
 0x189   :  { %v1351_v39 = vpop.f32.mrf.mxu0 }
 0x18a   :  { %v2058_v42 = vmax.f32 %v1994_v38, 0.0  ;;  %v1641_v43 = vadd.f32 %v1640_v63, %v1351_v39  ;;  %v1667_v53 = vpop.f32.mrf.mxu1 }
 0x18b   :  { %v1353_v44 = vpop.f32.mrf.mxu0 }
 0x18c   :  { %v2822_v46 = vpack.c.bf16 %v2058_v42, %v2057_v41  ;;  %v1995_v49 = vadd.f32 %v3655_v21, %v1641_v43  ;;  %v1669_v55 = vpop.f32.mrf.mxu1 }
 0x18d   :  { %v1354_v47 = vpop.f32.mrf.mxu0 }
 0x18e   :  { %2914 = vst [vmem:[#allocation3 + $0x80] sm:$0xff] %v2822_v46   ;;  %v1644_v51 = vadd.f32 %v1643_v7, %v1354_v47  ;;  %v2059_v56 = vmax.f32 %v1995_v49, 0.0  ;;  %v1672_v60 = vpop.f32.mrf.mxu1 }
 0x18f   :  { %v1356_v52 = vpop.f32.mrf.mxu0 }
 0x190   :  { %v1996_v50 = vadd.f32 %v3655_v21, %v1644_v51  ;;  %v1674_v63 = vpop.f32.mrf.mxu1 }
 0x191   :  { %v1359_v54 = vpop.f32.mrf.mxu0 }
 0x192   :  { %v2060_v57 = vmax.f32 %v1996_v50, 0.0  ;;  %v1649_v58 = vadd.f32 %v1648_v14, %v1359_v54  ;;  %v1675_v3 = vpop.f32.mrf.mxu1 }
 0x193   :  { %v1361_v59 = vpop.f32.mrf.mxu0 }
 0x194   :  { %v2827_v61 = vpack.c.bf16 %v2060_v57, %v2059_v56  ;;  %v1997_v0 = vadd.f32 %v3655_v21, %v1649_v58  ;;  %v1677_v7 = vpop.f32.mrf.mxu1 }
 0x195   :  { %v1362_v62 = vpop.f32.mrf.mxu0 }
 0x196   :  { %2915 = vst [vmem:[#allocation3 + $0x88] sm:$0xff] %v2827_v61   ;;  %v1652_v1 = vadd.f32 %v1651_v22, %v1362_v62  ;;  %v2061_v5 = vmax.f32 %v1997_v0, 0.0  ;;  %v1680_v11 = vpop.f32.mrf.mxu1 }
 0x197   :  { %v1364_v2 = vpop.f32.mrf.mxu0 }
 0x198   :  { %v1998_v4 = vadd.f32 %v3655_v21, %v1652_v1  ;;  %v1682_v14 = vpop.f32.mrf.mxu1 }
 0x199   :  { %v1367_v6 = vpop.f32.mrf.mxu0 }
 0x19a   :  { %v2062_v8 = vmax.f32 %v1998_v4, 0.0  ;;  %v1657_v9 = vadd.f32 %v1656_v30, %v1367_v6  ;;  %v1683_v18 = vpop.f32.mrf.mxu1 }
 0x19b   :  { %v1369_v10 = vpop.f32.mrf.mxu0 }
 0x19c   :  { %v2832_v12 = vpack.c.bf16 %v2062_v8, %v2061_v5  ;;  %v1999_v15 = vadd.f32 %v3655_v21, %v1657_v9  ;;  %v1685_v22 = vpop.f32.mrf.mxu1 }
 0x19d   :  { %v1370_v13 = vpop.f32.mrf.mxu0 }
 0x19e   :  { %2916 = vst [vmem:[#allocation3 + $0x90] sm:$0xff] %v2832_v12   ;;  %v1660_v16 = vadd.f32 %v1659_v37, %v1370_v13  ;;  %v2063_v23 = vmax.f32 %v1999_v15, 0.0  ;;  %v1688_v25 = vpop.f32.mrf.mxu1 }
 0x19f   :  { %v1372_v17 = vpop.f32.mrf.mxu0 }
 0x1a0   :  { %v2000_v19 = vadd.f32 %v3655_v21, %v1660_v16  ;;  %v1690_v30 = vpop.f32.mrf.mxu1 }
 0x1a1   :  { %v1375_v20 = vpop.f32.mrf.mxu0 }
 0x1a2   :  { %v2064_v24 = vmax.f32 %v2000_v19, 0.0  ;;  %v1665_v26 = vadd.f32 %v1664_v45, %v1375_v20  ;;  %v1691_v35 = vpop.f32.mrf.mxu1 }
 0x1a3   :  { %v1377_v27 = vpop.f32.mrf.mxu0 }
 0x1a4   :  { %v2837_v28 = vpack.c.bf16 %v2064_v24, %v2063_v23  ;;  %v2001_v32 = vadd.f32 %v3655_v21, %v1665_v26  ;;  %v1693_v37 = vpop.f32.mrf.mxu1 }
 0x1a5   :  { %v1378_v29 = vpop.f32.mrf.mxu0 }
 0x1a6   :  { %2917 = vst [vmem:[#allocation3 + $0x98] sm:$0xff] %v2837_v28   ;;  %v1668_v33 = vadd.f32 %v1667_v53, %v1378_v29  ;;  %v2065_v38 = vmax.f32 %v2001_v32, 0.0  ;;  %v1696_v42 = vpop.f32.mrf.mxu1 }
 0x1a7   :  { %v1380_v31 = vpop.f32.mrf.mxu0 }
 0x1a8   :  { %v2002_v36 = vadd.f32 %v3655_v21, %v1668_v33  ;;  %v1698_v45 = vpop.f32.mrf.mxu1 }
 0x1a9   :  { %v1383_v34 = vpop.f32.mrf.mxu0 }
 0x1aa   :  { %v2066_v39 = vmax.f32 %v2002_v36, 0.0  ;;  %v1673_v40 = vadd.f32 %v1672_v60, %v1383_v34  ;;  %v1699_v49 = vpop.f32.mrf.mxu1 }
 0x1ab   :  { %v1385_v41 = vpop.f32.mrf.mxu0 }
 0x1ac   :  { %v2842_v43 = vpack.c.bf16 %v2066_v39, %v2065_v38  ;;  %v2003_v46 = vadd.f32 %v3655_v21, %v1673_v40  ;;  %v1701_v53 = vpop.f32.mrf.mxu1 }
 0x1ad   :  { %v1386_v44 = vpop.f32.mrf.mxu0 }
 0x1ae   :  { %2918 = vst [vmem:[#allocation3 + $0xa0] sm:$0xff] %v2842_v43   ;;  %v1676_v47 = vadd.f32 %v1675_v3, %v1386_v44  ;;  %v2067_v50 = vmax.f32 %v2003_v46, 0.0  ;;  %v1704_v57 = vpop.f32.mrf.mxu1 }
 0x1af   :  { %v1388_v48 = vpop.f32.mrf.mxu0 }
 0x1b0   :  { %v2004_v51 = vadd.f32 %v3655_v21, %v1676_v47  ;;  %v1706_v60 = vpop.f32.mrf.mxu1 }
 0x1b1   :  { %v1391_v52 = vpop.f32.mrf.mxu0 }
 0x1b2   :  { %v2068_v54 = vmax.f32 %v2004_v51, 0.0  ;;  %v1681_v55 = vadd.f32 %v1680_v11, %v1391_v52  ;;  %v1707_v0 = vpop.f32.mrf.mxu1 }
 0x1b3   :  { %v1393_v56 = vpop.f32.mrf.mxu0 }
 0x1b4   :  { %v2847_v58 = vpack.c.bf16 %v2068_v54, %v2067_v50  ;;  %v2005_v61 = vadd.f32 %v3655_v21, %v1681_v55  ;;  %v1709_v3 = vpop.f32.mrf.mxu1 }
 0x1b5   :  { %v1394_v59 = vpop.f32.mrf.mxu0 }
 0x1b6   :  { %2919 = vst [vmem:[#allocation3 + $0xa8] sm:$0xff] %v2847_v58   ;;  %v1684_v62 = vadd.f32 %v1683_v18, %v1394_v59  ;;  %v2069_v4 = vmax.f32 %v2005_v61, 0.0  ;;  %v1712_v8 = vpop.f32.mrf.mxu1 }
 0x1b7   :  { %v1396_v63 = vpop.f32.mrf.mxu0 }
 0x1b8   :  { %v2006_v1 = vadd.f32 %v3655_v21, %v1684_v62  ;;  %v1714_v11 = vpop.f32.mrf.mxu1 }
 0x1b9   :  { %v1399_v2 = vpop.f32.mrf.mxu0 }
 0x1ba   :  { %v2070_v6 = vmax.f32 %v2006_v1, 0.0  ;;  %v1689_v7 = vadd.f32 %v1688_v25, %v1399_v2  ;;  %v1715_v15 = vpop.f32.mrf.mxu1 }
 0x1bb   :  { %v1401_v5 = vpop.f32.mrf.mxu0 }
 0x1bc   :  { %v2852_v9 = vpack.c.bf16 %v2070_v6, %v2069_v4  ;;  %v2007_v12 = vadd.f32 %v3655_v21, %v1689_v7  ;;  %v1717_v18 = vpop.f32.mrf.mxu1 }
 0x1bd   :  { %v1402_v10 = vpop.f32.mrf.mxu0 }
 0x1be   :  { %2920 = vst [vmem:[#allocation3 + $0xb0] sm:$0xff] %v2852_v9   ;;  %v1692_v13 = vadd.f32 %v1691_v35, %v1402_v10  ;;  %v2071_v19 = vmax.f32 %v2007_v12, 0.0  ;;  %v1720_v24 = vpop.f32.mrf.mxu1 }
 0x1bf   :  { %v1404_v14 = vpop.f32.mrf.mxu0 }
 0x1c0   :  { %v2008_v16 = vadd.f32 %v3655_v21, %v1692_v13  ;;  %v1722_v25 = vpop.f32.mrf.mxu1 }
 0x1c1   :  { %v1407_v17 = vpop.f32.mrf.mxu0 }
 0x1c2   :  { %v2072_v20 = vmax.f32 %v2008_v16, 0.0  ;;  %v1697_v22 = vadd.f32 %v1696_v42, %v1407_v17  ;;  %v1723_v32 = vpop.f32.mrf.mxu1 }
 0x1c3   :  { %v1409_v23 = vpop.f32.mrf.mxu0 }
 0x1c4   :  { %v2857_v26 = vpack.c.bf16 %v2072_v20, %v2071_v19  ;;  %v2009_v28 = vadd.f32 %v3655_v21, %v1697_v22  ;;  %v1725_v35 = vpop.f32.mrf.mxu1 }
 0x1c5   :  { %v1410_v27 = vpop.f32.mrf.mxu0 }
 0x1c6   :  { %2921 = vst [vmem:[#allocation3 + $0xb8] sm:$0xff] %v2857_v26   ;;  %v1700_v29 = vadd.f32 %v1699_v49, %v1410_v27  ;;  %v2073_v36 = vmax.f32 %v2009_v28, 0.0  ;;  %v1728_v39 = vpop.f32.mrf.mxu1 }
 0x1c7   :  { %v1412_v30 = vpop.f32.mrf.mxu0 }
 0x1c8   :  { %v2010_v33 = vadd.f32 %v3655_v21, %v1700_v29  ;;  %v1730_v42 = vpop.f32.mrf.mxu1 }
 0x1c9   :  { %v1415_v31 = vpop.f32.mrf.mxu0 }
 0x1ca   :  { %v2074_v34 = vmax.f32 %v2010_v33, 0.0  ;;  %v1705_v37 = vadd.f32 %v1704_v57, %v1415_v31  ;;  %v1731_v46 = vpop.f32.mrf.mxu1 }
 0x1cb   :  { %v1417_v38 = vpop.f32.mrf.mxu0 }
 0x1cc   :  { %v2862_v40 = vpack.c.bf16 %v2074_v34, %v2073_v36  ;;  %v2011_v43 = vadd.f32 %v3655_v21, %v1705_v37  ;;  %v1733_v49 = vpop.f32.mrf.mxu1 }
 0x1cd   :  { %v1418_v41 = vpop.f32.mrf.mxu0 }
 0x1ce   :  { %2922 = vst [vmem:[#allocation3 + $0xc0] sm:$0xff] %v2862_v40   ;;  %v1708_v44 = vadd.f32 %v1707_v0, %v1418_v41  ;;  %v2075_v51 = vmax.f32 %v2011_v43, 0.0  ;;  %v1736_v54 = vpop.f32.mrf.mxu1  ;;  %v3151_v41 = vld [vmem:[%s3807_s2] ss:$0 sm:$0xff]  ;;  %s3175_s2 = smov [#allocation3]  }
 0x1cf   :  { %v1420_v45 = vpop.f32.mrf.mxu0  ;;  %s2414_s15 = sshll.u32 %s3175_s2, 4  ;;  %s2415_s15 = int_to_ptr.vmem [resolvable:$true] %s2414_s15 }
 0x1d0   :  { %v2012_v47 = vadd.f32 %v3655_v21, %v1708_v44  ;;  %v1738_v57 = vpop.f32.mrf.mxu1  ;;  %s3152_s16 = scalar_lea.vmem %s2415_s15, 4096  ;;  %p3157_p1 = scmp.lt.s32.totalorder %s2415_s15, %s2415_s15 }
 0x1d1   :  { %v1423_v48 = vpop.f32.mrf.mxu0  ;;  %p3153_p0 = scmp.ne.s32.totalorder %s2415_s15, %s3152_s16  ;;  %p3158_p2 = scmp.lt.s32.totalorder %s3152_s16, %s3152_s16 }
 0x1d2   :  { %v2076_v52 = vmax.f32 %v2012_v47, 0.0  ;;  %v1713_v53 = vadd.f32 %v1712_v8, %v1423_v48  ;;  %v1739_v61 = vpop.f32.mrf.mxu1 }
 0x1d3   :  { %v1425_v50 = vpop.f32.mrf.mxu0  ;;  %p3159_p3 = por %p3158_p2, %p3157_p1 }
 0x1d4   :  { %v2867_v55 = vpack.c.bf16 %v2076_v52, %v2075_v51  ;;  %v2013_v58 = vadd.f32 %v3655_v21, %v1713_v53  ;;  %v1741_v0 = vpop.f32.mrf.mxu1 }
 0x1d5   :  { %v1426_v56 = vpop.f32.mrf.mxu0  ;;  %p3160_p4 = pnand %p3159_p3, %p3153_p0 }
 0x1d6   :  { %2923 = vst [vmem:[#allocation3 + $0xc8] sm:$0xff] %v2867_v55   ;;  %v1716_v59 = vadd.f32 %v1715_v15, %v1426_v56  ;;  %v2077_v1 = vmax.f32 %v2013_v58, 0.0  ;;  %v1744_v6 = vpop.f32.mrf.mxu1 }
 0x1d7   :  { %v1428_v60 = vpop.f32.mrf.mxu0 }
 0x1d8   :  { %v2014_v62 = vadd.f32 %v3655_v21, %v1716_v59  ;;  %v1746_v8 = vpop.f32.mrf.mxu1 }
 0x1d9   :  { %v1431_v63 = vpop.f32.mrf.mxu0 }
 0x1da   :  { %v2078_v2 = vmax.f32 %v2014_v62, 0.0  ;;  %v1721_v3 = vadd.f32 %v1720_v24, %v1431_v63  ;;  %v1747_v12 = vpop.f32.mrf.mxu1 }
 0x1db   :  { %v1433_v4 = vpop.f32.mrf.mxu0 }
 0x1dc   :  { %v2872_v7 = vpack.c.bf16 %v2078_v2, %v2077_v1  ;;  %v2015_v9 = vadd.f32 %v3655_v21, %v1721_v3  ;;  %v1749_v15 = vpop.f32.mrf.mxu1 }
 0x1dd   :  { %v1434_v5 = vpop.f32.mrf.mxu0 }
 0x1de   :  { %2924 = vst [vmem:[#allocation3 + $0xd0] sm:$0xff] %v2872_v7   ;;  %v1724_v10 = vadd.f32 %v1723_v32, %v1434_v5  ;;  %v2079_v16 = vmax.f32 %v2015_v9, 0.0  ;;  %v1752_v20 = vpop.f32.mrf.mxu1 }
 0x1df   :  { %v1436_v11 = vpop.f32.mrf.mxu0 }
 0x1e0   :  { %v2016_v13 = vadd.f32 %v3655_v21, %v1724_v10  ;;  %v1754_v24 = vpop.f32.mrf.mxu1 }
 0x1e1   :  { %v1439_v14 = vpop.f32.mrf.mxu0 }
 0x1e2   :  { %v2080_v17 = vmax.f32 %v2016_v13, 0.0  ;;  %v1729_v18 = vadd.f32 %v1728_v39, %v1439_v14  ;;  %v1755_v28 = vpop.f32.mrf.mxu1 }
 0x1e3   :  { %v1441_v19 = vpop.f32.mrf.mxu0 }
 0x1e4   :  { %v2877_v22 = vpack.c.bf16 %v2080_v17, %v2079_v16  ;;  %v2017_v26 = vadd.f32 %v3655_v21, %v1729_v18  ;;  %v1757_v32 = vpop.f32.mrf.mxu1 }
 0x1e5   :  { %v1442_v23 = vpop.f32.mrf.mxu0 }
 0x1e6   :  { %2925 = vst [vmem:[#allocation3 + $0xd8] sm:$0xff] %v2877_v22   ;;  %v1732_v27 = vadd.f32 %v1731_v46, %v1442_v23  ;;  %v2081_v33 = vmax.f32 %v2017_v26, 0.0 }
 0x1e7   :  { %v1444_v25 = vpop.f32.mrf.mxu0 }
 0x1e8   :  { %v2018_v29 = vadd.f32 %v3655_v21, %v1732_v27 }
 0x1e9   :  { %v1447_v30 = vpop.f32.mrf.mxu0 }
 0x1ea   :  { %v2082_v31 = vmax.f32 %v2018_v29, 0.0  ;;  %v1737_v35 = vadd.f32 %v1736_v54, %v1447_v30 }
 0x1eb   :  { %v1449_v36 = vpop.f32.mrf.mxu0 }
 0x1ec   :  { %v2882_v34 = vpack.c.bf16 %v2082_v31, %v2081_v33  ;;  %v2019_v38 = vadd.f32 %v3655_v21, %v1737_v35 }
 0x1ed   :  { %v1450_v37 = vpop.f32.mrf.mxu0 }
 0x1ee   :  { %2926 = vst [vmem:[#allocation3 + $0xe0] sm:$0xff] %v2882_v34   ;;  %v1740_v39 = vadd.f32 %v1739_v61, %v1450_v37  ;;  %v2083_v44 = vmax.f32 %v2019_v38, 0.0 }
 0x1ef   :  { %v1452_v40 = vpop.f32.mrf.mxu0 }
 0x1f0   :  { %v2020_v42 = vadd.f32 %v3151_v41, %v1740_v39 }
 0x1f1   :  { %v1455_v43 = vpop.f32.mrf.mxu0 }
 0x1f2   :  { %v2084_v45 = vmax.f32 %v2020_v42, 0.0  ;;  %v1745_v46 = vadd.f32 %v1744_v6, %v1455_v43 }
 0x1f3   :  { %v1457_v47 = vpop.f32.mrf.mxu0 }
 0x1f4   :  { %v2887_v48 = vpack.c.bf16 %v2084_v45, %v2083_v44  ;;  %v2021_v51 = vadd.f32 %v3151_v41, %v1745_v46 }
 0x1f5   :  { %v1458_v49 = vpop.f32.mrf.mxu0 }
 0x1f6   :  { %2927 = vst [vmem:[#allocation3 + $0xe8] sm:$0xff] %v2887_v48   ;;  %v1748_v52 = vadd.f32 %v1747_v12, %v1458_v49  ;;  %v2085_v54 = vmax.f32 %v2021_v51, 0.0 }
 0x1f7   :  { %v1460_v53 = vpop.f32.mrf.mxu0 }
 0x1f8   :  { %v2022_v50 = vadd.f32 %v3151_v41, %v1748_v52 }
 0x1f9   :  { %v1463_v21 = vpop.f32.mrf.mxu0 }
 0x1fa   :  { %v2086_v55 = vmax.f32 %v2022_v50, 0.0  ;;  %v1753_v56 = vadd.f32 %v1752_v20, %v1463_v21 }
 0x1fb   :  { %v1465_v57 = vpop.f32.mrf.mxu0 }
 0x1fc   :  { %v2892_v58 = vpack.c.bf16 %v2086_v55, %v2085_v54  ;;  %v2023_v60 = vadd.f32 %v3151_v41, %v1753_v56 }
 0x1fd   :  { %v1466_v59 = vpop.f32.mrf.mxu0 }
 0x1fe   :  { %2928 = vst [vmem:[#allocation3 + $0xf0] sm:$0xff] %v2892_v58   ;;  %v1756_v61 = vadd.f32 %v1755_v28, %v1466_v59  ;;  %v2087_v0 = vmax.f32 %v2023_v60, 0.0 }
 0x1ff   :  { %v1468_v62 = vpop.f32.mrf.mxu0 }
 0x200   :  { %v2024_v63 = vadd.f32 %v3151_v41, %v1756_v61 }
 0x202   :  { %v2088_v1 = vmax.f32 %v2024_v63, 0.0 }
 0x204   :  { %v2897_v2 = vpack.c.bf16 %v2088_v1, %v2087_v0 }
 0x206   :  { %2929 = vst [vmem:[#allocation3 + $0xf8] sm:$0xff] %v2897_v2  }
 0x207   :  { %3163 = shalt.err (!%p3160_p4)
}
 0x208   :  { %s3176_s17 = smov 64   ;;  %s3177_s18 = smov 4  }
 0x209   :  { %2420 = dma.vmem_to_hbm [thread:$0]  %s2415_s15, 4096, %s3808_s3, [#allocation4], %s3176_s17, %s3176_s17, %s3177_s18  }
 0x20a   :  { %3172 = dma.done.wait [#allocation4], 4096  }
 0x20b   :  { %3173 = vsyncadd [#allocation4], 4294963200 }
 0x20c   :  { %2424 = vsyncpa [#allocation4], 1 }

</bundles_post_ra>
